<compile_context>
chip_gen: v5e
topology: v5e:2x2
jax: 0.10.0
libtpu: 0.0.40
codegen_flags: <defaults>
</compile_context>

<pallas_src>
import jax
import jax.numpy as jnp
from jax import lax
from jax.experimental import pallas as pl
from jax.experimental.pallas import tpu as pltpu

_SUBLANES = 8          # output rows per edge tile (native sublane count)
_LANES = 128           # lane width


def _inner_product_decoder_kernel(idx_ref, zt_ref, out_ref):
    """Decode one tile of edges.

    idx_ref : VMEM int32 (1, 1, 2*tile_e) -- [col indices | row indices] on lanes
    zt_ref  : VMEM bf16  (D, N)           -- z transposed, resident every step
    out_ref : VMEM f32   (1, 8, tile_e/8) -- sigmoid(<z[col], z[row]>), dense block
    """
    sub = out_ref.shape[-2]
    lanes = out_ref.shape[-1]
    tile_e = sub * lanes
    n_nodes = zt_ref.shape[-1]

    idx = idx_ref[0]                                          # (1, 2*tile_e) int32

    # Single compare stream builds both one-hot selectors: iota over nodes on
    # the sublane axis, broadcast against the fused index row (no (N, tile_e)
    # iota materialized).  bf16 one-hots are exact (0/1).
    node_ids = lax.broadcasted_iota(jnp.int32, (n_nodes, 1), 0)        # (N, 1)
    onehot = (node_ids == idx).astype(zt_ref.dtype)           # (N, 2*tile_e) bf16

    # One fused MXU gather: z^T @ [onehot_col | onehot_row], f32 accumulate.
    g = jnp.dot(zt_ref[...], onehot,
                preferred_element_type=jnp.float32)           # (D, 2*tile_e) f32
    zc_t = g[:, :tile_e]                                      # (D, tile_e)
    zr_t = g[:, tile_e:]                                      # (D, tile_e)

    # Per-edge inner product: VPU multiply + sublane reduce -> (1, tile_e).
    s = jnp.sum(zc_t * zr_t, axis=0, keepdims=True)           # (1, tile_e) f32
    sig = jax.nn.sigmoid(s)

    # Repack the lane row into the dense (8, lanes) output block (unmasked,
    # (8,128)-aligned stores; static lane slices at multiples of 128).
    for r in range(sub):
        out_ref[0, r:r + 1, :] = sig[:, r * lanes:(r + 1) * lanes]


def inner_product_decoder(z, edge_indices, *, tile_e=None):
    """z: (N, D) float; edge_indices: (2, E) int (sparse-mask indices).

    Returns sigmoid(sum(z[col] * z[row], axis=1)) with shape (E,), float32.
    z is quantized to bf16 for the MXU gather (f32 accumulation); indices are
    assumed in-bounds (no runtime bounds check on VMEM refs).
    """
    z = jnp.asarray(z)
    n, d = z.shape
    col = jnp.asarray(edge_indices[0], jnp.int32)
    row = jnp.asarray(edge_indices[1], jnp.int32)
    e = col.shape[0]
    if e == 0:                       # empty edge set -> avoid a zero-sized grid
        return jnp.zeros((0,), jnp.float32)

    # Per-core VMEM capacity (128 MiB v5e/v6e, 64 MiB per TC on v7x).
    try:
        vmem_cap = int(pltpu.get_tpu_info().vmem_capacity_bytes)
    except Exception:
        vmem_cap = 64 * 1024 * 1024            # conservative default (v7x/TC)

    min_tile = _SUBLANES * _LANES              # 1024 edges per grid step minimum
    if tile_e is None:
        # Grow the edge tile while the (N, 2*tile_e) bf16 one-hot stays well
        # under the per-core VMEM budget (bigger tiles amortize the ~0.35 us
        # per-grid-step overhead), but never much past the real edge count.
        budget = max(vmem_cap // 4, 8 * 1024 * 1024)
        tile_e = min_tile
        while tile_e < 8 * min_tile and n * (2 * (2 * tile_e)) * 2 <= budget:
            tile_e *= 2
        e_rounded = ((e + min_tile - 1) // min_tile) * min_tile
        tile_e = max(min_tile, min(tile_e, e_rounded))
    assert tile_e % min_tile == 0, "tile_e must be a multiple of 8*128"
    sub = _SUBLANES
    lanes = tile_e // sub

    num_tiles = (e + tile_e - 1) // tile_e
    e_pad = num_tiles * tile_e

    # Padded entries gather node 0 (sigmoid(z0.z0)) and are sliced off below.
    col_p = jnp.pad(col, (0, e_pad - e)).reshape(num_tiles, tile_e)
    row_p = jnp.pad(row, (0, e_pad - e)).reshape(num_tiles, tile_e)
    # One aligned index DMA per step: [col tile | row tile] on the lane axis.
    cat_idx = jnp.concatenate([col_p, row_p], axis=1).reshape(num_tiles, 1,
                                                              2 * tile_e)
    # z^T resident in VMEM as bf16.
    z_t = jnp.asarray(z, jnp.float32).T.astype(jnp.bfloat16)   # (D, N)

    # VMEM budget: single-buffered bf16 z^T, double-buffered index/output
    # blocks, per-step intermediates; 2x headroom, capped below the per-core
    # capacity to leave ~16 MiB for compiler scratch.
    bytes_zt = d * n * 2                           # bf16, single copy
    bytes_idx = 2 * (2 * tile_e * 4)               # double-buffered int32
    bytes_out = 2 * (tile_e * 4)                   # double-buffered f32
    bytes_work = (n * 2 * tile_e * 2               # (N, 2*tile_e) bf16 one-hot
                  + d * 2 * tile_e * 4             # (D, 2*tile_e) f32 gather
                  + d * tile_e * 4                 # product
                  + 4 * tile_e * 4)                # row sums / sigmoid temps
    need = bytes_zt + bytes_idx + bytes_out + bytes_work
    vmem_limit = max(32 * 1024 * 1024, 2 * need)
    vmem_limit = int(min(vmem_limit, vmem_cap - 16 * 1024 * 1024))
    vmem_limit = max(vmem_limit, 16 * 1024 * 1024)

    cost = pl.CostEstimate(
        flops=int(2 * d * n * (2 * e_pad)          # fused one-hot gather matmul
                  + 2 * d * e_pad),                # per-edge product + reduce
        transcendentals=int(e_pad),                # sigmoid
        bytes_accessed=int(d * n * 2 + 2 * e_pad * 4 + e_pad * 4),
    )

    def run(single_buffer_zt):
        if single_buffer_zt:
            # Invariant block: constant index_map, single-buffered (halves the
            # resident z^T footprint; biggest payoff on v7x's 64 MiB/TC).
            zt_spec = pl.BlockSpec((d, n), lambda i: (0, 0),
                                   pipeline_mode=pl.Buffered(1))
        else:
            zt_spec = pl.BlockSpec((d, n), lambda i: (0, 0))
        return pl.pallas_call(
            _inner_product_decoder_kernel,
            out_shape=jax.ShapeDtypeStruct((num_tiles, sub, lanes), jnp.float32),
            grid_spec=pltpu.PrefetchScalarGridSpec(
                num_scalar_prefetch=0,
                grid=(num_tiles,),
                in_specs=[
                    pl.BlockSpec((1, 1, 2 * tile_e), lambda i: (i, 0, 0)),
                    zt_spec,
                ],
                out_specs=pl.BlockSpec((1, sub, lanes), lambda i: (i, 0, 0)),
            ),
            compiler_params=pltpu.CompilerParams(
                dimension_semantics=("parallel",),     # edge tiles independent
                vmem_limit_bytes=vmem_limit,
            ),
            cost_estimate=cost,
        )(cat_idx, z_t)

    try:
        out = run(True)
    except Exception:
        # Fallback if this JAX build does not honor pl.Buffered(1) on the
        # top-level pipeline: identical semantics, default double buffering.
        out = run(False)

    return out.reshape(e_pad)[:e]


def _reference(z, edge_indices):
    col = edge_indices[0]
    row = edge_indices[1]
    return jax.nn.sigmoid(jnp.sum(z[col] * z[row], axis=1))


if __name__ == "__main__":
    key = jax.random.PRNGKey(0)
    k_z, k_c, k_r = jax.random.split(key, 3)

    N, D, E = 16, 32, 20
    z = jax.random.normal(k_z, (N, D), dtype=jnp.float32)
    col = jax.random.randint(k_c, (E,), 0, N, dtype=jnp.int32)
    row = jax.random.randint(k_r, (E,), 0, N, dtype=jnp.int32)
    edge_indices = jnp.stack([col, row], axis=0)   # (2, E) sparse-mask indices

    result = inner_product_decoder(z, edge_indices)
    result = jax.block_until_ready(result)

    # The kernel quantizes z to bf16 for the MXU gather (one-hot selection and
    # f32 accumulation are exact), so check tightly against a bf16-quantized-z
    # reference and loosely against the full-f32 reference.
    z_q = z.astype(jnp.bfloat16).astype(jnp.float32)
    ref_q = _reference(z_q, edge_indices)
    ref_f = _reference(z, edge_indices)

    assert result.shape == (E,)
    assert jnp.allclose(result, ref_q, atol=1e-4, rtol=1e-4), (result, ref_q)
    assert jnp.allclose(result, ref_f, atol=1e-1), (result, ref_f)

    print("KERNEL_OK")
</pallas_src>

<mosaic_0001>
module attributes {stable_mosaic.version = 11 : i64} {
  func.func @_inner_product_decoder_kernel(%arg0: i32, %arg1: memref<1x1x2048xi32, #tpu.memory_space<vmem>>, %arg2: memref<32x16xbf16, #tpu.memory_space<vmem>>, %arg3: memref<1x8x128xf32, #tpu.memory_space<vmem>>) attributes {dimension_semantics = [#tpu.dimension_semantics<parallel>], iteration_bounds = array<i64: 1>, scalar_prefetch = 0 : i64, scratch_operands = 0 : i64, tpu.core_type = #tpu.core_type<tc>, window_params = [{transform_indices = @transform_0, window_bounds = array<i64: 1, 1, 2048>}, {pipeline_mode = #tpu.pipeline_mode<synchronous>, transform_indices = @transform_1, window_bounds = array<i64: 32, 16>}, {transform_indices = @transform_2, window_bounds = array<i64: 1, 8, 128>}]} {
    %c0 = arith.constant 0 : index
    %c0_0 = arith.constant 0 : index
    %c0_1 = arith.constant 0 : index
    %0 = vector.load %arg1[%c0, %c0_0, %c0_1] : memref<1x1x2048xi32, #tpu.memory_space<vmem>>, vector<1x1x2048xi32>
    %1 = vector.shape_cast %0 : vector<1x1x2048xi32> to vector<1x2048xi32>
    %2 = tpu.iota {dimensions = array<i32: 0>} : vector<16x1xi32>
    %3 = vector.broadcast %2 : vector<16x1xi32> to vector<16x2048xi32>
    %4 = vector.broadcast %1 : vector<1x2048xi32> to vector<16x2048xi32>
    %5 = arith.cmpi eq, %3, %4 : vector<16x2048xi32>
    %6 = arith.extui %5 : vector<16x2048xi1> to vector<16x2048xi32>
    %7 = arith.sitofp %6 : vector<16x2048xi32> to vector<16x2048xf32>
    %8 = arith.truncf %7 : vector<16x2048xf32> to vector<16x2048xbf16>
    %c0_2 = arith.constant 0 : index
    %c0_3 = arith.constant 0 : index
    %9 = vector.load %arg2[%c0_2, %c0_3] : memref<32x16xbf16, #tpu.memory_space<vmem>>, vector<32x16xbf16>
    %cst = arith.constant dense<0.000000e+00> : vector<32x2048xf32>
    %10 = tpu.matmul %9, %8, %cst {dimension_numbers = #tpu.dot_dimension_numbers<[1], [0], [0], [1], [0, 0, 1, 1], [], []>} : vector<32x16xbf16>, vector<16x2048xbf16>, vector<32x2048xf32> -> vector<32x2048xf32>
    %11 = vector.extract_strided_slice %10 {offsets = [0, 0], sizes = [32, 1024], strides = [1, 1]} : vector<32x2048xf32> to vector<32x1024xf32>
    %12 = vector.extract_strided_slice %10 {offsets = [0, 1024], sizes = [32, 1024], strides = [1, 1]} : vector<32x2048xf32> to vector<32x1024xf32>
    %13 = arith.mulf %11, %12 : vector<32x1024xf32>
    %cst_4 = arith.constant dense<0.000000e+00> : vector<1024xf32>
    %14 = vector.multi_reduction <add>, %13, %cst_4 [0] : vector<32x1024xf32> to vector<1024xf32>
    %15 = vector.shape_cast %14 : vector<1024xf32> to vector<1x1024xf32>
    %16 = arith.negf %15 : vector<1x1024xf32>
    %17 = math.exp %16 : vector<1x1024xf32>
    %cst_5 = arith.constant 1.000000e+00 : f32
    %18 = vector.broadcast %cst_5 : f32 to vector<1x1024xf32>
    %19 = arith.addf %18, %17 : vector<1x1024xf32>
    %20 = arith.divf %18, %19 : vector<1x1024xf32>
    %21 = vector.extract_strided_slice %20 {offsets = [0, 0], sizes = [1, 128], strides = [1, 1]} : vector<1x1024xf32> to vector<1x128xf32>
    %c0_6 = arith.constant 0 : index
    %c0_7 = arith.constant 0 : index
    %c0_8 = arith.constant 0 : index
    %22 = vector.load %arg3[%c0_6, %c0_7, %c0_8] : memref<1x8x128xf32, #tpu.memory_space<vmem>>, vector<1x1x128xf32>
    %23 = vector.shape_cast %22 : vector<1x1x128xf32> to vector<1x128xf32>
    %24 = vector.shape_cast %21 : vector<1x128xf32> to vector<1x1x128xf32>
    tpu.vector_store %arg3[%c0_6, %c0_7, %c0_8], %24 {strides = array<i32>} : memref<1x8x128xf32, #tpu.memory_space<vmem>>, vector<1x1x128xf32>,
    %25 = vector.extract_strided_slice %20 {offsets = [0, 128], sizes = [1, 128], strides = [1, 1]} : vector<1x1024xf32> to vector<1x128xf32>
    %c0_9 = arith.constant 0 : index
    %c1 = arith.constant 1 : index
    %c0_10 = arith.constant 0 : index
    %26 = vector.load %arg3[%c0_9, %c1, %c0_10] : memref<1x8x128xf32, #tpu.memory_space<vmem>>, vector<1x1x128xf32>
    %27 = vector.shape_cast %26 : vector<1x1x128xf32> to vector<1x128xf32>
    %28 = vector.shape_cast %25 : vector<1x128xf32> to vector<1x1x128xf32>
    tpu.vector_store %arg3[%c0_9, %c1, %c0_10], %28 {strides = array<i32>} : memref<1x8x128xf32, #tpu.memory_space<vmem>>, vector<1x1x128xf32>,
    %29 = vector.extract_strided_slice %20 {offsets = [0, 256], sizes = [1, 128], strides = [1, 1]} : vector<1x1024xf32> to vector<1x128xf32>
    %c0_11 = arith.constant 0 : index
    %c2 = arith.constant 2 : index
    %c0_12 = arith.constant 0 : index
    %30 = vector.load %arg3[%c0_11, %c2, %c0_12] : memref<1x8x128xf32, #tpu.memory_space<vmem>>, vector<1x1x128xf32>
    %31 = vector.shape_cast %30 : vector<1x1x128xf32> to vector<1x128xf32>
    %32 = vector.shape_cast %29 : vector<1x128xf32> to vector<1x1x128xf32>
    tpu.vector_store %arg3[%c0_11, %c2, %c0_12], %32 {strides = array<i32>} : memref<1x8x128xf32, #tpu.memory_space<vmem>>, vector<1x1x128xf32>,
    %33 = vector.extract_strided_slice %20 {offsets = [0, 384], sizes = [1, 128], strides = [1, 1]} : vector<1x1024xf32> to vector<1x128xf32>
    %c0_13 = arith.constant 0 : index
    %c3 = arith.constant 3 : index
    %c0_14 = arith.constant 0 : index
    %34 = vector.load %arg3[%c0_13, %c3, %c0_14] : memref<1x8x128xf32, #tpu.memory_space<vmem>>, vector<1x1x128xf32>
    %35 = vector.shape_cast %34 : vector<1x1x128xf32> to vector<1x128xf32>
    %36 = vector.shape_cast %33 : vector<1x128xf32> to vector<1x1x128xf32>
    tpu.vector_store %arg3[%c0_13, %c3, %c0_14], %36 {strides = array<i32>} : memref<1x8x128xf32, #tpu.memory_space<vmem>>, vector<1x1x128xf32>,
    %37 = vector.extract_strided_slice %20 {offsets = [0, 512], sizes = [1, 128], strides = [1, 1]} : vector<1x1024xf32> to vector<1x128xf32>
    %c0_15 = arith.constant 0 : index
    %c4 = arith.constant 4 : index
    %c0_16 = arith.constant 0 : index
    %38 = vector.load %arg3[%c0_15, %c4, %c0_16] : memref<1x8x128xf32, #tpu.memory_space<vmem>>, vector<1x1x128xf32>
    %39 = vector.shape_cast %38 : vector<1x1x128xf32> to vector<1x128xf32>
    %40 = vector.shape_cast %37 : vector<1x128xf32> to vector<1x1x128xf32>
    tpu.vector_store %arg3[%c0_15, %c4, %c0_16], %40 {strides = array<i32>} : memref<1x8x128xf32, #tpu.memory_space<vmem>>, vector<1x1x128xf32>,
    %41 = vector.extract_strided_slice %20 {offsets = [0, 640], sizes = [1, 128], strides = [1, 1]} : vector<1x1024xf32> to vector<1x128xf32>
    %c0_17 = arith.constant 0 : index
    %c5 = arith.constant 5 : index
    %c0_18 = arith.constant 0 : index
    %42 = vector.load %arg3[%c0_17, %c5, %c0_18] : memref<1x8x128xf32, #tpu.memory_space<vmem>>, vector<1x1x128xf32>
    %43 = vector.shape_cast %42 : vector<1x1x128xf32> to vector<1x128xf32>
    %44 = vector.shape_cast %41 : vector<1x128xf32> to vector<1x1x128xf32>
    tpu.vector_store %arg3[%c0_17, %c5, %c0_18], %44 {strides = array<i32>} : memref<1x8x128xf32, #tpu.memory_space<vmem>>, vector<1x1x128xf32>,
    %45 = vector.extract_strided_slice %20 {offsets = [0, 768], sizes = [1, 128], strides = [1, 1]} : vector<1x1024xf32> to vector<1x128xf32>
    %c0_19 = arith.constant 0 : index
    %c6 = arith.constant 6 : index
    %c0_20 = arith.constant 0 : index
    %46 = vector.load %arg3[%c0_19, %c6, %c0_20] : memref<1x8x128xf32, #tpu.memory_space<vmem>>, vector<1x1x128xf32>
    %47 = vector.shape_cast %46 : vector<1x1x128xf32> to vector<1x128xf32>
    %48 = vector.shape_cast %45 : vector<1x128xf32> to vector<1x1x128xf32>
    tpu.vector_store %arg3[%c0_19, %c6, %c0_20], %48 {strides = array<i32>} : memref<1x8x128xf32, #tpu.memory_space<vmem>>, vector<1x1x128xf32>,
    %49 = vector.extract_strided_slice %20 {offsets = [0, 896], sizes = [1, 128], strides = [1, 1]} : vector<1x1024xf32> to vector<1x128xf32>
    %c0_21 = arith.constant 0 : index
    %c7 = arith.constant 7 : index
    %c0_22 = arith.constant 0 : index
    %50 = vector.load %arg3[%c0_21, %c7, %c0_22] : memref<1x8x128xf32, #tpu.memory_space<vmem>>, vector<1x1x128xf32>
    %51 = vector.shape_cast %50 : vector<1x1x128xf32> to vector<1x128xf32>
    %52 = vector.shape_cast %49 : vector<1x128xf32> to vector<1x1x128xf32>
    tpu.vector_store %arg3[%c0_21, %c7, %c0_22], %52 {strides = array<i32>} : memref<1x8x128xf32, #tpu.memory_space<vmem>>, vector<1x1x128xf32>,
    return
  }
  func.func @transform_0(%arg0: i32) -> (i32, i32, i32) {
    %c0_i32 = arith.constant 0 : i32
    %c0_i32_0 = arith.constant 0 : i32
    %c0_i32_1 = arith.constant 0 : i32
    return %arg0, %c0_i32, %c0_i32_0 : i32, i32, i32
  }
  func.func @transform_1(%arg0: i32) -> (i32, i32) {
    %c0_i32 = arith.constant 0 : i32
    %c0_i32_0 = arith.constant 0 : i32
    %c0_i32_1 = arith.constant 0 : i32
    return %c0_i32, %c0_i32_0 : i32, i32
  }
  func.func @transform_2(%arg0: i32) -> (i32, i32, i32) {
    %c0_i32 = arith.constant 0 : i32
    %c0_i32_0 = arith.constant 0 : i32
    %c0_i32_1 = arith.constant 0 : i32
    return %arg0, %c0_i32, %c0_i32_0 : i32, i32, i32
  }
}

module attributes {stable_mosaic.version = 11 : i64} {
  func.func @_inner_product_decoder_kernel(%arg0: i32, %arg1: memref<1x1x2048xi32, #tpu.memory_space<vmem>>, %arg2: memref<32x16xbf16, #tpu.memory_space<vmem>>, %arg3: memref<1x8x128xf32, #tpu.memory_space<vmem>>) attributes {dimension_semantics = [#tpu.dimension_semantics<parallel>], iteration_bounds = array<i64: 1>, scalar_prefetch = 0 : i64, scratch_operands = 0 : i64, tpu.core_type = #tpu.core_type<tc>, window_params = [{transform_indices = @transform_0, window_bounds = array<i64: 1, 1, 2048>}, {pipeline_mode = #tpu.pipeline_mode<synchronous>, transform_indices = @transform_1, window_bounds = array<i64: 32, 16>}, {transform_indices = @transform_2, window_bounds = array<i64: 1, 8, 128>}]} {
    %c0 = arith.constant 0 : index
    %c0_0 = arith.constant 0 : index
    %c0_1 = arith.constant 0 : index
    %0 = vector.load %arg1[%c0, %c0_0, %c0_1] : memref<1x1x2048xi32, #tpu.memory_space<vmem>>, vector<1x1x2048xi32>
    %1 = vector.shape_cast %0 : vector<1x1x2048xi32> to vector<1x2048xi32>
    %2 = tpu.iota {dimensions = array<i32: 0>} : vector<16x1xi32>
    %3 = vector.broadcast %2 : vector<16x1xi32> to vector<16x2048xi32>
    %4 = vector.broadcast %1 : vector<1x2048xi32> to vector<16x2048xi32>
    %5 = arith.cmpi eq, %3, %4 : vector<16x2048xi32>
    %6 = arith.extui %5 : vector<16x2048xi1> to vector<16x2048xi32>
    %7 = arith.sitofp %6 : vector<16x2048xi32> to vector<16x2048xf32>
    %8 = arith.truncf %7 : vector<16x2048xf32> to vector<16x2048xbf16>
    %c0_2 = arith.constant 0 : index
    %c0_3 = arith.constant 0 : index
    %9 = vector.load %arg2[%c0_2, %c0_3] : memref<32x16xbf16, #tpu.memory_space<vmem>>, vector<32x16xbf16>
    %cst = arith.constant dense<0.000000e+00> : vector<32x2048xf32>
    %10 = tpu.matmul %9, %8, %cst {dimension_numbers = #tpu.dot_dimension_numbers<[1], [0], [0], [1], [0, 0, 1, 1], [], []>} : vector<32x16xbf16>, vector<16x2048xbf16>, vector<32x2048xf32> -> vector<32x2048xf32>
    %11 = vector.extract_strided_slice %10 {offsets = [0, 0], sizes = [32, 1024], strides = [1, 1]} : vector<32x2048xf32> to vector<32x1024xf32>
    %12 = vector.extract_strided_slice %10 {offsets = [0, 1024], sizes = [32, 1024], strides = [1, 1]} : vector<32x2048xf32> to vector<32x1024xf32>
    %13 = arith.mulf %11, %12 : vector<32x1024xf32>
    %cst_4 = arith.constant dense<0.000000e+00> : vector<1024xf32>
    %14 = vector.multi_reduction <add>, %13, %cst_4 [0] : vector<32x1024xf32> to vector<1024xf32>
    %15 = vector.shape_cast %14 : vector<1024xf32> to vector<1x1024xf32>
    %16 = arith.negf %15 : vector<1x1024xf32>
    %17 = math.exp %16 : vector<1x1024xf32>
    %cst_5 = arith.constant 1.000000e+00 : f32
    %18 = vector.broadcast %cst_5 : f32 to vector<1x1024xf32>
    %19 = arith.addf %18, %17 : vector<1x1024xf32>
    %20 = arith.divf %18, %19 : vector<1x1024xf32>
    %21 = vector.extract_strided_slice %20 {offsets = [0, 0], sizes = [1, 128], strides = [1, 1]} : vector<1x1024xf32> to vector<1x128xf32>
    %c0_6 = arith.constant 0 : index
    %c0_7 = arith.constant 0 : index
    %c0_8 = arith.constant 0 : index
    %22 = vector.load %arg3[%c0_6, %c0_7, %c0_8] : memref<1x8x128xf32, #tpu.memory_space<vmem>>, vector<1x1x128xf32>
    %23 = vector.shape_cast %22 : vector<1x1x128xf32> to vector<1x128xf32>
    %24 = vector.shape_cast %21 : vector<1x128xf32> to vector<1x1x128xf32>
    tpu.vector_store %arg3[%c0_6, %c0_7, %c0_8], %24 {strides = array<i32>} : memref<1x8x128xf32, #tpu.memory_space<vmem>>, vector<1x1x128xf32>,
    %25 = vector.extract_strided_slice %20 {offsets = [0, 128], sizes = [1, 128], strides = [1, 1]} : vector<1x1024xf32> to vector<1x128xf32>
    %c0_9 = arith.constant 0 : index
    %c1 = arith.constant 1 : index
    %c0_10 = arith.constant 0 : index
    %26 = vector.load %arg3[%c0_9, %c1, %c0_10] : memref<1x8x128xf32, #tpu.memory_space<vmem>>, vector<1x1x128xf32>
    %27 = vector.shape_cast %26 : vector<1x1x128xf32> to vector<1x128xf32>
    %28 = vector.shape_cast %25 : vector<1x128xf32> to vector<1x1x128xf32>
    tpu.vector_store %arg3[%c0_9, %c1, %c0_10], %28 {strides = array<i32>} : memref<1x8x128xf32, #tpu.memory_space<vmem>>, vector<1x1x128xf32>,
    %29 = vector.extract_strided_slice %20 {offsets = [0, 256], sizes = [1, 128], strides = [1, 1]} : vector<1x1024xf32> to vector<1x128xf32>
    %c0_11 = arith.constant 0 : index
    %c2 = arith.constant 2 : index
    %c0_12 = arith.constant 0 : index
    %30 = vector.load %arg3[%c0_11, %c2, %c0_12] : memref<1x8x128xf32, #tpu.memory_space<vmem>>, vector<1x1x128xf32>
    %31 = vector.shape_cast %30 : vector<1x1x128xf32> to vector<1x128xf32>
    %32 = vector.shape_cast %29 : vector<1x128xf32> to vector<1x1x128xf32>
    tpu.vector_store %arg3[%c0_11, %c2, %c0_12], %32 {strides = array<i32>} : memref<1x8x128xf32, #tpu.memory_space<vmem>>, vector<1x1x128xf32>,
    %33 = vector.extract_strided_slice %20 {offsets = [0, 384], sizes = [1, 128], strides = [1, 1]} : vector<1x1024xf32> to vector<1x128xf32>
    %c0_13 = arith.constant 0 : index
    %c3 = arith.constant 3 : index
    %c0_14 = arith.constant 0 : index
    %34 = vector.load %arg3[%c0_13, %c3, %c0_14] : memref<1x8x128xf32, #tpu.memory_space<vmem>>, vector<1x1x128xf32>
    %35 = vector.shape_cast %34 : vector<1x1x128xf32> to vector<1x128xf32>
    %36 = vector.shape_cast %33 : vector<1x128xf32> to vector<1x1x128xf32>
    tpu.vector_store %arg3[%c0_13, %c3, %c0_14], %36 {strides = array<i32>} : memref<1x8x128xf32, #tpu.memory_space<vmem>>, vector<1x1x128xf32>,
    %37 = vector.extract_strided_slice %20 {offsets = [0, 512], sizes = [1, 128], strides = [1, 1]} : vector<1x1024xf32> to vector<1x128xf32>
    %c0_15 = arith.constant 0 : index
    %c4 = arith.constant 4 : index
    %c0_16 = arith.constant 0 : index
    %38 = vector.load %arg3[%c0_15, %c4, %c0_16] : memref<1x8x128xf32, #tpu.memory_space<vmem>>, vector<1x1x128xf32>
    %39 = vector.shape_cast %38 : vector<1x1x128xf32> to vector<1x128xf32>
    %40 = vector.shape_cast %37 : vector<1x128xf32> to vector<1x1x128xf32>
    tpu.vector_store %arg3[%c0_15, %c4, %c0_16], %40 {strides = array<i32>} : memref<1x8x128xf32, #tpu.memory_space<vmem>>, vector<1x1x128xf32>,
    %41 = vector.extract_strided_slice %20 {offsets = [0, 640], sizes = [1, 128], strides = [1, 1]} : vector<1x1024xf32> to vector<1x128xf32>
    %c0_17 = arith.constant 0 : index
    %c5 = arith.constant 5 : index
    %c0_18 = arith.constant 0 : index
    %42 = vector.load %arg3[%c0_17, %c5, %c0_18] : memref<1x8x128xf32, #tpu.memory_space<vmem>>, vector<1x1x128xf32>
    %43 = vector.shape_cast %42 : vector<1x1x128xf32> to vector<1x128xf32>
    %44 = vector.shape_cast %41 : vector<1x128xf32> to vector<1x1x128xf32>
    tpu.vector_store %arg3[%c0_17, %c5, %c0_18], %44 {strides = array<i32>} : memref<1x8x128xf32, #tpu.memory_space<vmem>>, vector<1x1x128xf32>,
    %45 = vector.extract_strided_slice %20 {offsets = [0, 768], sizes = [1, 128], strides = [1, 1]} : vector<1x1024xf32> to vector<1x128xf32>
    %c0_19 = arith.constant 0 : index
    %c6 = arith.constant 6 : index
    %c0_20 = arith.constant 0 : index
    %46 = vector.load %arg3[%c0_19, %c6, %c0_20] : memref<1x8x128xf32, #tpu.memory_space<vmem>>, vector<1x1x128xf32>
    %47 = vector.shape_cast %46 : vector<1x1x128xf32> to vector<1x128xf32>
    %48 = vector.shape_cast %45 : vector<1x128xf32> to vector<1x1x128xf32>
    tpu.vector_store %arg3[%c0_19, %c6, %c0_20], %48 {strides = array<i32>} : memref<1x8x128xf32, #tpu.memory_space<vmem>>, vector<1x1x128xf32>,
    %49 = vector.extract_strided_slice %20 {offsets = [0, 896], sizes = [1, 128], strides = [1, 1]} : vector<1x1024xf32> to vector<1x128xf32>
    %c0_21 = arith.constant 0 : index
    %c7 = arith.constant 7 : index
    %c0_22 = arith.constant 0 : index
    %50 = vector.load %arg3[%c0_21, %c7, %c0_22] : memref<1x8x128xf32, #tpu.memory_space<vmem>>, vector<1x1x128xf32>
    %51 = vector.shape_cast %50 : vector<1x1x128xf32> to vector<1x128xf32>
    %52 = vector.shape_cast %49 : vector<1x128xf32> to vector<1x1x128xf32>
    tpu.vector_store %arg3[%c0_21, %c7, %c0_22], %52 {strides = array<i32>} : memref<1x8x128xf32, #tpu.memory_space<vmem>>, vector<1x1x128xf32>,
    return
  }
  func.func @transform_0(%arg0: i32) -> (i32, i32, i32) {
    %c0_i32 = arith.constant 0 : i32
    %c0_i32_0 = arith.constant 0 : i32
    %c0_i32_1 = arith.constant 0 : i32
    return %arg0, %c0_i32, %c0_i32_0 : i32, i32, i32
  }
  func.func @transform_1(%arg0: i32) -> (i32, i32) {
    %c0_i32 = arith.constant 0 : i32
    %c0_i32_0 = arith.constant 0 : i32
    %c0_i32_1 = arith.constant 0 : i32
    return %c0_i32, %c0_i32_0 : i32, i32
  }
  func.func @transform_2(%arg0: i32) -> (i32, i32, i32) {
    %c0_i32 = arith.constant 0 : i32
    %c0_i32_0 = arith.constant 0 : i32
    %c0_i32_1 = arith.constant 0 : i32
    return %arg0, %c0_i32, %c0_i32_0 : i32, i32, i32
  }
}

</mosaic_0001>

<bundles_post_ra>
// kernel: tpu_custom_call.1
= control target key start
LH: loop header
LB: loop body
LE: loop exit
PB: predicated region body
PF: predicated region fallthrough
CT: control target
= control target key end

     0   :  { %v15_v1 = vlaneseq  ;;  %s1213_s0 = inlined_call_operand.vmem [shape: s32[1,1,2048], index: 0, kind: input, shape index: {}]   ;;  %s1214_s1 = inlined_call_operand.vmem [shape: bf16[32,16], index: 1, kind: input, shape index: {}]   ;;  %s1215_s2 = inlined_call_operand.hbm [shape: f32[1,8,128], index: 2, kind: output, shape index: {}]  }
   0x1   :  { %v13_v0 = vld [vmem:[%s1213_s0] sm:$0xff] }
   0x2   :  { %v18_v2 = vperm.slane %v13_v0, 0  ;;  %v19_v3 = vperm.slane %v13_v0, 1 }
   0x3   :  { %7 = vsyncpa [#allocation3], 0  ;;  %v945_v4 = vshrl.u32 %v15_v1, 7  ;;  %v20_v5 = vperm.slane %v13_v0, 2  ;;  %v21_v6 = vperm.slane %v13_v0, 3  ;;  %v24_v9 = vperm.slane %v13_v0, 6 }
   0x4   :  { %v25_v11 = vperm.slane %v13_v0, 7  ;;  %v22_v12 = vperm.slane %v13_v0, 4  ;;  %v987_v17 = vld [vmem:[%s1214_s1] sm:$0xff]  ;;  %v23_v18 = vperm.slane %v13_v0, 5  ;;  %v925_v19 = vmov 1.0|1.0  }
   0x5   :  { %v948_v7 = vadd.s32 8, %v945_v4  ;;  %vm951_vm0 = vcmp.eq.s32.totalorder %v945_v4, %v18_v2  ;;  %vm956_vm1 = vcmp.eq.s32.totalorder %v945_v4, %v19_v3  ;;  %vm963_vm4 = vcmp.eq.s32.totalorder %v945_v4, %v20_v5  ;;  %v14_v23 = vld [vmem:[%s1213_s0 + $0x8] sm:$0xff]  ;;  %s742_s19 = sshll.u32 %s1215_s2, 4  ;;  %s743_s19 = int_to_ptr.hbm [resolvable:$true] %s742_s19 }
   0x6   :  { %vm975_vm7 = vcmp.eq.s32.totalorder %v945_v4, %v21_v6  ;;  %vm160_vm10 = vcmask 130048   ;;  %vm993_vm11 = vcmp.eq.s32.totalorder %v945_v4, %v24_v9  ;;  %vm1008_vm14 = vcmp.eq.s32.totalorder %v945_v4, %v25_v11  ;;  %v864_v28 = vld [vmem:[%s1214_s1 + $0x8] sm:$0xff]  ;;  %s926_s1 = smov [#allocation2]  }
   0x7   :  { %vm50_vm2 = vcmp.eq.s32.totalorder %v948_v7, %v18_v2  ;;  %vm51_vm3 = vcmp.eq.s32.totalorder %v948_v7, %v19_v3  ;;  %vm968_vm5 = vcmp.eq.s32.totalorder %v948_v7, %v20_v5  ;;  %vm980_vm8 = vcmp.eq.s32.totalorder %v948_v7, %v21_v6  ;;  %s740_s16 = sshll.u32 %s926_s1, 4  ;;  %s741_s16 = int_to_ptr.vmem [resolvable:$true] %s740_s16 }
   0x8   :  { %vm791_vm6 = vmpackc.low %vm50_vm2, %vm951_vm0  ;;  %vm998_vm12 = vcmp.eq.s32.totalorder %v948_v7, %v24_v9  ;;  %vm57_vm15 = vcmp.eq.s32.totalorder %v948_v7, %v25_v11  ;;  %vm54_vm2 = vcmp.eq.s32.totalorder %v948_v7, %v22_v12  ;;  %v28_v24 = vperm.slane %v14_v23, 2 }
   0x9   :  { %792 = vmatpush.bf16.msk.msra.mxu0 %vm791_vm6, %v925_v19  ;;  %vm795_vm9 = vmpackc.low %vm51_vm3, %vm956_vm1  ;;  %vm38_vm1 = vcmp.eq.s32.totalorder %v945_v4, %v22_v12  ;;  %v29_v25 = vperm.slane %v14_v23, 3  ;;  %v26_v26 = vperm.slane %v14_v23, 0  ;;  %v27_v27 = vperm.slane %v14_v23, 1 }
   0xa   :  { %796 = vmatpush.bf16.msk.msra.mxu1 %vm795_vm9, %v925_v19  ;;  %vm799_vm13 = vmpackc.low %vm968_vm5, %vm963_vm4  ;;  %vm39_vm4 = vcmp.eq.s32.totalorder %v945_v4, %v23_v18  ;;  %vm55_vm5 = vcmp.eq.s32.totalorder %v948_v7, %v23_v18  ;;  %vm44_vm9 = vcmp.eq.s32.totalorder %v945_v4, %v28_v24  ;;  %v32_v29 = vperm.slane %v14_v23, 6 }
   0xb   :  { %800 = vmatpush.bf16.msk.msra.mxu2 %vm799_vm13, %v925_v19  ;;  %vm803_vm0 = vmpackc.low %vm980_vm8, %vm975_vm7  ;;  %vm61_vm13 = vcmp.eq.s32.totalorder %v948_v7, %v29_v25  ;;  %v33_v30 = vperm.slane %v14_v23, 7  ;;  %v30_v31 = vperm.slane %v14_v23, 4  ;;  %v31_v32 = vperm.slane %v14_v23, 5 }
   0xc   :  { %804 = vmatpush.bf16.msk.msra.mxu3 %vm803_vm0, %v925_v19  ;;  %793 = vmatmul.msk.bf16.vlgmr.msra.gmra.mxu0 %vm160_vm10, %v987_v17  ;;  %vm815_vm3 = vmpackc.low %vm998_vm12, %vm993_vm11  ;;  %vm60_vm11 = vcmp.eq.s32.totalorder %v948_v7, %v28_v24  ;;  %vm45_vm12 = vcmp.eq.s32.totalorder %v945_v4, %v29_v25  ;;  %vm58_vm0 = vcmp.eq.s32.totalorder %v948_v7, %v26_v26 }
   0xd   :  { %797 = vmatmul.msk.bf16.vlgmr.msra.gmra.mxu1 %vm160_vm10, %v987_v17  ;;  %vm819_vm6 = vmpackc.low %vm57_vm15, %vm1008_vm14  ;;  %vm42_vm15 = vcmp.eq.s32.totalorder %v945_v4, %v26_v26 }
   0xe   :  { %801 = vmatmul.msk.bf16.vlgmr.msra.gmra.mxu2 %vm160_vm10, %v987_v17  ;;  %vm807_vm7 = vmpackc.low %vm54_vm2, %vm38_vm1  ;;  %vm43_vm1 = vcmp.eq.s32.totalorder %v945_v4, %v27_v27  ;;  %vm59_vm2 = vcmp.eq.s32.totalorder %v948_v7, %v27_v27 }
   0xf   :  { %816 = vmatpush.bf16.msk.msrb.mxu2 %vm815_vm3, %v925_v19  ;;  %805 = vmatmul.msk.bf16.vlgmr.msra.gmra.mxu3 %vm160_vm10, %v987_v17  ;;  %vm811_vm8 = vmpackc.low %vm55_vm5, %vm39_vm4 }
  0x10   :  { %820 = vmatpush.bf16.msk.msrb.mxu3 %vm819_vm6, %v925_v19  ;;  %808 = vmatpush.bf16.msk.msrb.mxu0 %vm807_vm7, %v925_v19  ;;  %vm831_vm14 = vmpackc.low %vm60_vm11, %vm44_vm9  ;;  %vm48_vm6 = vcmp.eq.s32.totalorder %v945_v4, %v32_v29  ;;  %vm64_vm7 = vcmp.eq.s32.totalorder %v948_v7, %v32_v29  ;;  %vm65_vm9 = vcmp.eq.s32.totalorder %v948_v7, %v33_v30 }
  0x11   :  { %812 = vmatpush.bf16.msk.msrb.mxu1 %vm811_vm8, %v925_v19  ;;  %vm835_vm3 = vmpackc.low %vm61_vm13, %vm45_vm12  ;;  %vm49_vm8 = vcmp.eq.s32.totalorder %v945_v4, %v33_v30  ;;  %vm46_vm12 = vcmp.eq.s32.totalorder %v945_v4, %v30_v31  ;;  %vm62_vm13 = vcmp.eq.s32.totalorder %v948_v7, %v30_v31 }
  0x12   :  { %vm823_vm4 = vmpackc.low %vm58_vm0, %vm42_vm15  ;;  %vm63_vm15 = vcmp.eq.s32.totalorder %v948_v7, %v31_v32 }
  0x13   :  { %832 = vmatpush.bf16.msk.msra.mxu2 %vm831_vm14, %v925_v19  ;;  %vm827_vm5 = vmpackc.low %vm59_vm2, %vm43_vm1  ;;  %vm47_vm14 = vcmp.eq.s32.totalorder %v945_v4, %v31_v32 }
  0x14   :  { %836 = vmatpush.bf16.msk.msra.mxu3 %vm835_vm3, %v925_v19  ;;  %824 = vmatpush.bf16.msk.msra.mxu0 %vm823_vm4, %v925_v19  ;;  %vm847_vm11 = vmpackc.low %vm64_vm7, %vm48_vm6 }
  0x15   :  { %828 = vmatpush.bf16.msk.msra.mxu1 %vm827_vm5, %v925_v19  ;;  %vm851_vm0 = vmpackc.low %vm65_vm9, %vm49_vm8 }
  0x16   :  { %vm839_vm1 = vmpackc.low %vm62_vm13, %vm46_vm12 }
  0x17   :  { %vm843_vm2 = vmpackc.low %vm63_vm15, %vm47_vm14 }
  0x1c   :  { %794 = vmatmul.msk.bf16.gmra.mxu0 %vm160_vm10, %v864_v28 }
  0x1d   :  { %798 = vmatmul.msk.bf16.gmra.mxu1 %vm160_vm10, %v864_v28 }
  0x1e   :  { %802 = vmatmul.msk.bf16.gmra.mxu2 %vm160_vm10, %v864_v28 }
  0x1f   :  { %806 = vmatmul.msk.bf16.gmra.mxu3 %vm160_vm10, %v864_v28 }
  0x2c   :  { %809 = vmatmul.msk.bf16.vlgmr.msrb.gmra.mxu0 %vm160_vm10, %v987_v17 }
  0x2d   :  { %813 = vmatmul.msk.bf16.vlgmr.msrb.gmra.mxu1 %vm160_vm10, %v987_v17  ;;  %840 = vmatpush.bf16.msk.msrb.mxu0 %vm839_vm1, %v925_v19 }
  0x2e   :  { %817 = vmatmul.msk.bf16.vlgmr.msrb.gmra.mxu2 %vm160_vm10, %v987_v17  ;;  %844 = vmatpush.bf16.msk.msrb.mxu1 %vm843_vm2, %v925_v19 }
  0x2f   :  { %821 = vmatmul.msk.bf16.vlgmr.msrb.gmra.mxu3 %vm160_vm10, %v987_v17  ;;  %848 = vmatpush.bf16.msk.msrb.mxu2 %vm847_vm11, %v925_v19 }
  0x30   :  { %852 = vmatpush.bf16.msk.msrb.mxu3 %vm851_vm0, %v925_v19 }
  0x3c   :  { %810 = vmatmul.msk.bf16.gmra.mxu0 %vm160_vm10, %v864_v28 }
  0x3d   :  { %814 = vmatmul.msk.bf16.gmra.mxu1 %vm160_vm10, %v864_v28 }
  0x3e   :  { %818 = vmatmul.msk.bf16.gmra.mxu2 %vm160_vm10, %v864_v28 }
  0x3f   :  { %822 = vmatmul.msk.bf16.gmra.mxu3 %vm160_vm10, %v864_v28 }
  0x4c   :  { %825 = vmatmul.msk.bf16.vlgmr.msra.gmra.mxu0 %vm160_vm10, %v987_v17 }
  0x4d   :  { %829 = vmatmul.msk.bf16.vlgmr.msra.gmra.mxu1 %vm160_vm10, %v987_v17 }
  0x4e   :  { %833 = vmatmul.msk.bf16.vlgmr.msra.gmra.mxu2 %vm160_vm10, %v987_v17 }
  0x4f   :  { %837 = vmatmul.msk.bf16.vlgmr.msra.gmra.mxu3 %vm160_vm10, %v987_v17 }
  0x5c   :  { %826 = vmatmul.msk.bf16.gmra.mxu0 %vm160_vm10, %v864_v28 }
  0x5d   :  { %830 = vmatmul.msk.bf16.gmra.mxu1 %vm160_vm10, %v864_v28 }
  0x5e   :  { %834 = vmatmul.msk.bf16.gmra.mxu2 %vm160_vm10, %v864_v28 }
  0x5f   :  { %838 = vmatmul.msk.bf16.gmra.mxu3 %vm160_vm10, %v864_v28 }
  0x6c   :  { %841 = vmatmul.msk.bf16.vlgmr.msrb.gmra.mxu0 %vm160_vm10, %v987_v17 }
  0x6d   :  { %845 = vmatmul.msk.bf16.vlgmr.msrb.gmra.mxu1 %vm160_vm10, %v987_v17 }
  0x6e   :  { %849 = vmatmul.msk.bf16.vlgmr.msrb.gmra.mxu2 %vm160_vm10, %v987_v17 }
  0x6f   :  { %853 = vmatmul.msk.bf16.vlgmr.msrb.gmra.mxu3 %vm160_vm10, %v987_v17 }
  0x7c   :  { %842 = vmatmul.msk.bf16.gmra.mxu0 %vm160_vm10, %v864_v28 }
  0x7d   :  { %846 = vmatmul.msk.bf16.gmra.mxu1 %vm160_vm10, %v864_v28 }
  0x7e   :  { %850 = vmatmul.msk.bf16.gmra.mxu2 %vm160_vm10, %v864_v28 }
  0x7f   :  { %854 = vmatmul.msk.bf16.gmra.mxu3 %vm160_vm10, %v864_v28 }
  0x89   :  { %v176_v33 = vpop.f32.mrf.mxu0 }
  0x8a   :  { %v195_v34 = vpop.f32.mrf.mxu1 }
  0x91   :  { %v214_v35 = vpop.f32.mrf.mxu2  ;;  %v178_v36 = vpop.f32.mrf.mxu0 }
  0x92   :  { %v233_v37 = vpop.f32.mrf.mxu3  ;;  %v197_v38 = vpop.f32.mrf.mxu1 }
  0x99   :  { %v216_v39 = vpop.f32.mrf.mxu2  ;;  %v181_v40 = vpop.f32.mrf.mxu0 }
  0x9a   :  { %v235_v41 = vpop.f32.mrf.mxu3  ;;  %v200_v42 = vpop.f32.mrf.mxu1 }
  0xa1   :  { %v219_v43 = vpop.f32.mrf.mxu2  ;;  %v183_v44 = vpop.f32.mrf.mxu0 }
  0xa2   :  { %v238_v45 = vpop.f32.mrf.mxu3  ;;  %v202_v46 = vpop.f32.mrf.mxu1 }
  0xa9   :  { %v1111_v47 = vpop.f32.mrf.mxu2  ;;  %v1113_v48 = vpop.f32.mrf.mxu0 }
  0xaa   :  { %v1115_v49 = vpop.f32.mrf.mxu3  ;;  %v1117_v50 = vpop.f32.mrf.mxu1 }
  0xb1   :  { %v1119_v51 = vpop.f32.mrf.mxu2  ;;  %v1121_v52 = vpop.f32.mrf.mxu0 }
  0xb2   :  { %v1123_v53 = vpop.f32.mrf.mxu3  ;;  %v1125_v54 = vpop.f32.mrf.mxu1 }
  0xb9   :  { %v1127_v55 = vpop.f32.mrf.mxu2  ;;  %v1129_v56 = vpop.f32.mrf.mxu0 }
  0xba   :  { %v1131_v57 = vpop.f32.mrf.mxu3  ;;  %v1133_v58 = vpop.f32.mrf.mxu1 }
  0xc1   :  { %v1135_v59 = vpop.f32.mrf.mxu2  ;;  %v1137_v60 = vpop.f32.mrf.mxu0 }
  0xc2   :  { %v1139_v61 = vpop.f32.mrf.mxu3  ;;  %v1141_v62 = vpop.f32.mrf.mxu1 }
  0xc9   :  { %v1143_v63 = vpop.f32.mrf.mxu2  ;;  %v328_v0 = vpop.f32.mrf.mxu0 }
  0xca   :  { %v1145_v1 = vpop.f32.mrf.mxu3  ;;  %v347_v2 = vpop.f32.mrf.mxu1  ;;  %v471_v5 = vmul.f32 %v328_v0, %v176_v33 }
  0xcb   :  { %v472_v9 = vmul.f32 %v347_v2, %v195_v34 }
  0xd1   :  { %v366_v3 = vpop.f32.mrf.mxu2  ;;  %v330_v4 = vpop.f32.mrf.mxu0 }
  0xd2   :  { %v385_v6 = vpop.f32.mrf.mxu3  ;;  %v479_v7 = vmul.f32 %v330_v4, %v178_v36  ;;  %v349_v8 = vpop.f32.mrf.mxu1  ;;  %v473_v15 = vmul.f32 %v366_v3, %v214_v35 }
  0xd3   :  { %v480_v10 = vmul.f32 %v349_v8, %v197_v38  ;;  %v474_v20 = vmul.f32 %v385_v6, %v233_v37 }
  0xd4   :  { %v503_v11 = vadd.f32 %v479_v7, %v471_v5 }
  0xd5   :  { %v512_v12 = vadd.f32 %v480_v10, %v472_v9 }
  0xd9   :  { %v368_v13 = vpop.f32.mrf.mxu2  ;;  %v333_v14 = vpop.f32.mrf.mxu0 }
  0xda   :  { %v481_v16 = vmul.f32 %v368_v13, %v216_v39  ;;  %v387_v17 = vpop.f32.mrf.mxu3  ;;  %v487_v18 = vmul.f32 %v333_v14, %v181_v40  ;;  %v352_v19 = vpop.f32.mrf.mxu1 }
  0xdb   :  { %v482_v21 = vmul.f32 %v387_v17, %v235_v41  ;;  %v488_v22 = vmul.f32 %v352_v19, %v200_v42 }
  0xdc   :  { %v521_v23 = vadd.f32 %v481_v16, %v473_v15  ;;  %v504_v24 = vadd.f32 %v503_v11, %v487_v18 }
  0xdd   :  { %v530_v25 = vadd.f32 %v482_v21, %v474_v20  ;;  %v513_v26 = vadd.f32 %v512_v12, %v488_v22 }
  0xe1   :  { %v371_v27 = vpop.f32.mrf.mxu2  ;;  %v335_v28 = vpop.f32.mrf.mxu0 }
  0xe2   :  { %v489_v29 = vmul.f32 %v371_v27, %v219_v43  ;;  %v390_v30 = vpop.f32.mrf.mxu3  ;;  %v495_v31 = vmul.f32 %v335_v28, %v183_v44  ;;  %v354_v32 = vpop.f32.mrf.mxu1 }
  0xe3   :  { %v490_v33 = vmul.f32 %v390_v30, %v238_v45  ;;  %v496_v34 = vmul.f32 %v354_v32, %v202_v46 }
  0xe4   :  { %v522_v35 = vadd.f32 %v521_v23, %v489_v29  ;;  %v505_v36 = vadd.f32 %v504_v24, %v495_v31 }
  0xe5   :  { %v531_v38 = vadd.f32 %v530_v25, %v490_v33  ;;  %v514_v39 = vadd.f32 %v513_v26, %v496_v34 }
  0xe6   :  { %v506_v40 = vrot.slane %v505_v36, 4 }
  0xe7   :  { %v515_v37 = vrot.slane %v514_v39, 4 }
  0xe8   :  { %v507_v41 = vadd.f32 %v506_v40, %v505_v36 }
  0xe9   :  { %v516_v42 = vadd.f32 %v515_v37, %v514_v39  ;;  %v373_v0 = vpop.f32.mrf.mxu2  ;;  %v404_v2 = vpop.f32.mrf.mxu0 }
  0xea   :  { %v508_v3 = vrot.slane %v507_v41, 2  ;;  %v497_v4 = vmul.f32 %v373_v0, %v1111_v47  ;;  %v392_v5 = vpop.f32.mrf.mxu3  ;;  %v423_v43 = vpop.f32.mrf.mxu1  ;;  %v475_v20 = vmul.f32 %v404_v2, %v1113_v48 }
  0xeb   :  { %v517_v6 = vrot.slane %v516_v42, 2  ;;  %v498_v44 = vmul.f32 %v392_v5, %v1115_v49  ;;  %v476_v25 = vmul.f32 %v423_v43, %v1117_v50 }
  0xec   :  { %v509_v45 = vadd.f32 %v508_v3, %v507_v41  ;;  %v523_v46 = vadd.f32 %v522_v35, %v497_v4 }
  0xed   :  { %v518_v7 = vadd.f32 %v517_v6, %v516_v42  ;;  %v532_v8 = vadd.f32 %v531_v38, %v498_v44 }
  0xee   :  { %v510_v9 = vrot.slane %v509_v45, 1  ;;  %v524_v10 = vrot.slane %v523_v46, 4 }
  0xef   :  { %v519_v11 = vrot.slane %v518_v7, 1  ;;  %v533_v12 = vrot.slane %v532_v8, 4 }
  0xf0   :  { %v511_v13 = vadd.f32 %v510_v9, %v509_v45  ;;  %v525_v14 = vadd.f32 %v524_v10, %v523_v46 }
  0xf1   :  { %v520_v15 = vadd.f32 %v519_v11, %v518_v7  ;;  %v534_v16 = vadd.f32 %v533_v12, %v532_v8  ;;  %v442_v17 = vpop.f32.mrf.mxu2  ;;  %v406_v18 = vpop.f32.mrf.mxu0 }
  0xf2   :  { %v855_v47 = vmul.f32 -1.442695, %v511_v13  ;;  %v526_v19 = vrot.slane %v525_v14, 2  ;;  %v461_v21 = vpop.f32.mrf.mxu3  ;;  %v483_v49 = vmul.f32 %v406_v18, %v1121_v52  ;;  %v425_v22 = vpop.f32.mrf.mxu1  ;;  %v477_v38 = vmul.f32 %v442_v17, %v1119_v51 }
  0xf3   :  { %v856_v23 = vmul.f32 -1.442695, %v520_v15  ;;  %v535_v24 = vrot.slane %v534_v16, 2  ;;  %v484_v26 = vmul.f32 %v425_v22, %v1125_v54  ;;  %v478_v51 = vmul.f32 %v461_v21, %v1123_v53 }
  0xf4   :  { %867 = vpow2.f32 %v855_v47  ;;  %v527_v27 = vadd.f32 %v526_v19, %v525_v14  ;;  %v539_v28 = vadd.f32 %v483_v49, %v475_v20 }
  0xf5   :  { %869 = vpow2.f32 %v856_v23  ;;  %v536_v29 = vadd.f32 %v535_v24, %v534_v16  ;;  %v548_v30 = vadd.f32 %v484_v26, %v476_v25 }
  0xf6   :  { %v528_v31 = vrot.slane %v527_v27, 1 }
  0xf7   :  { %v537_v32 = vrot.slane %v536_v29, 1 }
  0xf8   :  { %v529_v33 = vadd.f32 %v528_v31, %v527_v27 }
  0xf9   :  { %v538_v48 = vadd.f32 %v537_v32, %v536_v29  ;;  %v444_v34 = vpop.f32.mrf.mxu2  ;;  %v409_v35 = vpop.f32.mrf.mxu0 }
  0xfa   :  { %v868_v52 = vpop.eup %867  ;;  %v857_v36 = vmul.f32 -1.442695, %v529_v33  ;;  %v485_v50 = vmul.f32 %v444_v34, %v1127_v55  ;;  %v463_v39 = vpop.f32.mrf.mxu3  ;;  %v491_v54 = vmul.f32 %v409_v35, %v1129_v56 }
  0xfb   :  { %v428_v40 = vpop.f32.mrf.mxu1  ;;  %v870_v37 = vpop.eup %869  ;;  %v599_v41 = vadd.f32 1.0, %v868_v52  ;;  %v858_v42 = vmul.f32 -1.442695, %v538_v48  ;;  %v486_v0 = vmul.f32 %v463_v39, %v1131_v57 }
  0xfc   :  { %v492_v2 = vmul.f32 %v428_v40, %v1133_v58  ;;  %v1158_v3 = vadd.f32 1.0, %v870_v37  ;;  %871 = vpow2.f32 %v857_v36  ;;  %v557_v4 = vadd.f32 %v485_v50, %v477_v38 }
  0xfd   :  { %v540_v5 = vadd.f32 %v539_v28, %v491_v54  ;;  %873 = vrcp.f32 %v599_v41  ;;  %v566_v55 = vadd.f32 %v486_v0, %v478_v51  ;;  %v616_v45 = vand.u32 2147483647, %v599_v41 }
  0xfe   :  { %875 = vrcp.f32 %v1158_v3  ;;  %v549_v56 = vadd.f32 %v548_v30, %v492_v2  ;;  %v618_v57 = vand.u32 2147483648, %v599_v41  ;;  %vm612_vm10 = vweird.f32 %v599_v41 }
  0xff   :  { %877 = vpow2.f32 %v858_v42  ;;  %vm627_vm3 = vweird.f32 %v1158_v3  ;;  %v633_v17 = vand.u32 2147483648, %v1158_v3  ;;  %vm1173_vm4 = vcmp.eq.f32.partialorder %v616_v45, 8.507059e+37 }
 0x101   :  { %v447_v43 = vpop.f32.mrf.mxu2  ;;  %v411_v6 = vpop.f32.mrf.mxu0  ;;  %v634_v26 = vor.u32 1.1754944e-38, %v633_v17 }
 0x102   :  { %v872_v44 = vpop.eup %871  ;;  %v493_v58 = vmul.f32 %v447_v43, %v1135_v59  ;;  %v466_v46 = vpop.f32.mrf.mxu3  ;;  %v499_v7 = vmul.f32 %v411_v6, %v1137_v60  ;;  %v631_v60 = vand.u32 2147483647, %v1158_v3 }
 0x103   :  { %v430_v8 = vpop.f32.mrf.mxu1  ;;  %v874_v9 = vpop.eup %873  ;;  %v1164_v10 = vadd.f32 1.0, %v872_v44  ;;  %v494_v53 = vmul.f32 %v466_v46, %v1139_v61 }
 0x104   :  { %v500_v11 = vmul.f32 %v430_v8, %v1141_v62  ;;  %v876_v12 = vpop.eup %875  ;;  %v608_v13 = vmul.f32 %v874_v9, %v599_v41  ;;  %v558_v14 = vadd.f32 %v557_v4, %v493_v58  ;;  %v541_v15 = vadd.f32 %v540_v5, %v499_v7 }
 0x105   :  { %v878_v16 = vpop.eup %877  ;;  %v623_v59 = vmul.f32 %v876_v12, %v1158_v3  ;;  %879 = vrcp.f32 %v1164_v10  ;;  %v619_v62 = vor.u32 1.1754944e-38, %v618_v57  ;;  %v567_v20 = vadd.f32 %v566_v55, %v494_v53 }
 0x106   :  { %v609_v18 = vsub.f32 1.0, %v608_v13  ;;  %v1177_v47 = vadd.f32 1.0, %v878_v16  ;;  %v542_v21 = vrot.slane %v541_v15, 4  ;;  %v550_v49 = vadd.f32 %v549_v56, %v500_v11 }
 0x107   :  { %v624_v19 = vsub.f32 1.0, %v623_v59  ;;  %vm613_vm5 = vweird.f32 %v874_v9  ;;  %v646_v23 = vand.u32 2147483647, %v1164_v10  ;;  %vm628_vm6 = vweird.f32 %v876_v12 }
 0x108   :  { %v610_v22 = vmul.f32 %v874_v9, %v609_v18  ;;  %881 = vrcp.f32 %v1177_v47  ;;  %vm1181_vm7 = vcmp.eq.f32.partialorder %v631_v60, 8.507059e+37  ;;  %v543_v29 = vadd.f32 %v542_v21, %v541_v15  ;;  %vm614_vm8 = vmor %vm612_vm10, %vm613_vm5 }
 0x109   :  { %v625_v24 = vmul.f32 %v876_v12, %v624_v19  ;;  %v449_v27 = vpop.f32.mrf.mxu2  ;;  %v551_v30 = vrot.slane %v550_v49, 4  ;;  %vm642_vm9 = vweird.f32 %v1164_v10  ;;  %v648_v34 = vand.u32 2147483648, %v1164_v10  ;;  %vm629_vm11 = vmor %vm627_vm3, %vm628_vm6 }
 0x10a   :  { %v611_v28 = vadd.f32 %v874_v9, %v610_v22  ;;  %v501_v31 = vmul.f32 %v449_v27, %v1143_v63  ;;  %v468_v32 = vpop.f32.mrf.mxu3  ;;  %vm1194_vm12 = vcmp.eq.f32.partialorder %v646_v23, 8.507059e+37  ;;  %v544_v38 = vrot.slane %v543_v29, 2 }
 0x10b   :  { %v880_v33 = vpop.eup %879  ;;  %v626_v48 = vadd.f32 %v876_v12, %v625_v24  ;;  %v502_v35 = vmul.f32 %v468_v32, %v1145_v1  ;;  %v552_v54 = vadd.f32 %v551_v30, %v550_v49  ;;  %v649_v2 = vor.u32 1.1754944e-38, %v648_v34 }
 0x10c   :  { %v615_v52 = vsel %vm614_vm8, %v874_v9, %v611_v28  ;;  %v638_v36 = vmul.f32 %v880_v33, %v1164_v10  ;;  %v559_v40 = vadd.f32 %v558_v14, %v501_v31  ;;  %v545_v42 = vadd.f32 %v544_v38, %v543_v29 }
 0x10d   :  { %v620_v50 = vsel %vm1173_vm4, %v619_v62, %v615_v52  ;;  %v630_v39 = vsel %vm629_vm11, %v876_v12, %v626_v48  ;;  %v568_v0 = vadd.f32 %v567_v20, %v502_v35  ;;  %v553_v4 = vrot.slane %v552_v54, 2 }
 0x10e   :  { %v882_v37 = vpop.eup %881  ;;  %727 = vst [vmem:[#allocation2] sm:$0x1] %v620_v50  ;;  %v635_v1 = vsel %vm1181_vm7, %v634_v26, %v630_v39  ;;  %v639_v41 = vsub.f32 1.0, %v638_v36  ;;  %v560_v5 = vrot.slane %v559_v40, 4  ;;  %vm643_vm13 = vweird.f32 %v880_v33 }
 0x10f   :  { %728 = vst [vmem:[#allocation2 + $0x1] sm:$0x1] %v635_v1  ;;  %v653_v3 = vmul.f32 %v882_v37, %v1177_v47  ;;  %v546_v55 = vrot.slane %v545_v42, 1  ;;  %v569_v56 = vrot.slane %v568_v0, 4  ;;  %v661_v6 = vand.u32 2147483647, %v1177_v47  ;;  %vm644_vm14 = vmor %vm642_vm9, %vm643_vm13 }
 0x110   :  { %v640_v51 = vmul.f32 %v880_v33, %v639_v41  ;;  %v554_v44 = vadd.f32 %v553_v4, %v552_v54  ;;  %v561_v45 = vadd.f32 %v560_v5, %v559_v40  ;;  %v663_v58 = vand.u32 2147483648, %v1177_v47 }
 0x111   :  { %v654_v43 = vsub.f32 1.0, %v653_v3  ;;  %v547_v46 = vadd.f32 %v546_v55, %v545_v42  ;;  %v570_v7 = vadd.f32 %v569_v56, %v568_v0  ;;  %vm658_vm15 = vweird.f32 %v882_v37 }
 0x112   :  { %v641_v57 = vadd.f32 %v880_v33, %v640_v51  ;;  %v555_v9 = vrot.slane %v554_v44, 1  ;;  %v562_v53 = vrot.slane %v561_v45, 2  ;;  %vm657_vm0 = vweird.f32 %v1177_v47 }
 0x113   :  { %v655_v8 = vmul.f32 %v882_v37, %v654_v43  ;;  %v859_v12 = vmul.f32 -1.442695, %v547_v46  ;;  %v571_v13 = vrot.slane %v570_v7, 2  ;;  %vm659_vm1 = vmor %vm657_vm0, %vm658_vm15  ;;  %v664_v60 = vor.u32 1.1754944e-38, %v663_v58 }
 0x114   :  { %v645_v11 = vsel %vm644_vm14, %v880_v33, %v641_v57  ;;  %v556_v16 = vadd.f32 %v555_v9, %v554_v44  ;;  %v563_v59 = vadd.f32 %v562_v53, %v561_v45  ;;  %vm662_vm2 = vcmp.eq.f32.partialorder %v661_v6, 8.507059e+37 }
 0x115   :  { %v650_v14 = vsel %vm1194_vm12, %v649_v2, %v645_v11  ;;  %v656_v15 = vadd.f32 %v882_v37, %v655_v8  ;;  %883 = vpow2.f32 %v859_v12  ;;  %v572_v10 = vadd.f32 %v571_v13, %v570_v7 }
 0x116   :  { %729 = vst [vmem:[#allocation2 + $0x2] sm:$0x1] %v650_v14  ;;  %v860_v18 = vmul.f32 -1.442695, %v556_v16  ;;  %v564_v61 = vrot.slane %v563_v59, 1 }
 0x117   :  { %v660_v17 = vsel %vm659_vm1, %v882_v37, %v656_v15  ;;  %v573_v19 = vrot.slane %v572_v10, 1 }
 0x118   :  { %v665_v62 = vsel %vm662_vm2, %v664_v60, %v660_v17  ;;  %885 = vpow2.f32 %v860_v18  ;;  %v565_v47 = vadd.f32 %v564_v61, %v563_v59 }
 0x119   :  { %730 = vst [vmem:[#allocation2 + $0x3] sm:$0x1] %v665_v62  ;;  %v574_v20 = vadd.f32 %v573_v19, %v572_v10 }
 0x11a   :  { %v861_v21 = vmul.f32 -1.442695, %v565_v47 }
 0x11b   :  { %v884_v49 = vpop.eup %883  ;;  %v862_v22 = vmul.f32 -1.442695, %v574_v20 }
 0x11c   :  { %v603_v23 = vadd.f32 1.0, %v884_v49  ;;  %887 = vpow2.f32 %v861_v21 }
 0x11d   :  { %889 = vpow2.f32 %v862_v22 }
 0x11e   :  { %v886_v24 = vpop.eup %885  ;;  %891 = vrcp.f32 %v603_v23  ;;  %v676_v48 = vand.u32 2147483647, %v603_v23  ;;  %v678_v34 = vand.u32 2147483648, %v603_v23  ;;  %vm672_vm3 = vweird.f32 %v603_v23 }
 0x11f   :  { %v604_v25 = vadd.f32 1.0, %v886_v24 }
 0x120   :  { %vm677_vm4 = vcmp.eq.f32.partialorder %v676_v48, 8.507059e+37  ;;  %v679_v40 = vor.u32 1.1754944e-38, %v678_v34 }
 0x121   :  { %893 = vrcp.f32 %v604_v25  ;;  %v691_v36 = vand.u32 2147483647, %v604_v25  ;;  %v693_v38 = vand.u32 2147483648, %v604_v25  ;;  %vm687_vm7 = vweird.f32 %v604_v25 }
 0x122   :  { %v888_v26 = vpop.eup %887 }
 0x123   :  { %v890_v27 = vpop.eup %889  ;;  %v605_v28 = vadd.f32 1.0, %v888_v26  ;;  %vm692_vm8 = vcmp.eq.f32.partialorder %v691_v36, 8.507059e+37  ;;  %v694_v3 = vor.u32 1.1754944e-38, %v693_v38 }
 0x124   :  { %v892_v29 = vpop.eup %891  ;;  %v606_v30 = vadd.f32 1.0, %v890_v27 }
 0x125   :  { %v668_v31 = vmul.f32 %v892_v29, %v603_v23  ;;  %895 = vrcp.f32 %v605_v28  ;;  %vm673_vm10 = vweird.f32 %v892_v29  ;;  %v706_v5 = vand.u32 2147483647, %v605_v28 }
 0x126   :  { %897 = vrcp.f32 %v606_v30  ;;  %vm674_vm5 = vmor %vm672_vm3, %vm673_vm10  ;;  %v708_v51 = vand.u32 2147483648, %v605_v28  ;;  %v723_v6 = vand.u32 2147483648, %v606_v30  ;;  %v721_v57 = vand.u32 2147483647, %v606_v30 }
 0x127   :  { %v894_v32 = vpop.eup %893  ;;  %v669_v33 = vsub.f32 1.0, %v668_v31  ;;  %vm702_vm13 = vweird.f32 %v605_v28  ;;  %vm717_vm15 = vweird.f32 %v606_v30  ;;  %vm707_vm0 = vcmp.eq.f32.partialorder %v706_v5, 8.507059e+37 }
 0x128   :  { %v683_v35 = vmul.f32 %v894_v32, %v604_v25  ;;  %vm688_vm6 = vweird.f32 %v894_v32  ;;  %v709_v46 = vor.u32 1.1754944e-38, %v708_v51  ;;  %v724_v9 = vor.u32 1.1754944e-38, %v723_v6 }
 0x129   :  { %v670_v52 = vmul.f32 %v892_v29, %v669_v33  ;;  %vm689_vm9 = vmor %vm687_vm7, %vm688_vm6  ;;  %vm722_vm2 = vcmp.eq.f32.partialorder %v721_v57, 8.507059e+37 }
 0x12a   :  { %v684_v63 = vsub.f32 1.0, %v683_v35 }
 0x12b   :  { %v896_v50 = vpop.eup %895  ;;  %v671_v39 = vadd.f32 %v892_v29, %v670_v52 }
 0x12c   :  { %v898_v54 = vpop.eup %897  ;;  %v685_v37 = vmul.f32 %v894_v32, %v684_v63  ;;  %v698_v1 = vmul.f32 %v896_v50, %v605_v28  ;;  %vm703_vm11 = vweird.f32 %v896_v50 }
 0x12d   :  { %v675_v41 = vsel %vm674_vm5, %v892_v29, %v671_v39  ;;  %v713_v42 = vmul.f32 %v898_v54, %v606_v30  ;;  %vm718_vm12 = vweird.f32 %v898_v54  ;;  %vm704_vm14 = vmor %vm702_vm13, %vm703_vm11 }
 0x12e   :  { %v680_v0 = vsel %vm677_vm4, %v679_v40, %v675_v41  ;;  %v686_v2 = vadd.f32 %v894_v32, %v685_v37  ;;  %v699_v4 = vsub.f32 1.0, %v698_v1  ;;  %vm719_vm1 = vmor %vm717_vm15, %vm718_vm12 }
 0x12f   :  { %731 = vst [vmem:[#allocation2 + $0x4] sm:$0x1] %v680_v0  ;;  %v714_v55 = vsub.f32 1.0, %v713_v42 }
 0x130   :  { %v690_v56 = vsel %vm689_vm9, %v894_v32, %v686_v2  ;;  %v700_v43 = vmul.f32 %v896_v50, %v699_v4 }
 0x131   :  { %v695_v44 = vsel %vm692_vm8, %v694_v3, %v690_v56  ;;  %v715_v45 = vmul.f32 %v898_v54, %v714_v55 }
 0x132   :  { %732 = vst [vmem:[#allocation2 + $0x5] sm:$0x1] %v695_v44  ;;  %v701_v58 = vadd.f32 %v896_v50, %v700_v43 }
 0x133   :  { %v716_v7 = vadd.f32 %v898_v54, %v715_v45 }
 0x134   :  { %v705_v8 = vsel %vm704_vm14, %v896_v50, %v701_v58 }
 0x135   :  { %v710_v53 = vsel %vm707_vm0, %v709_v46, %v705_v8  ;;  %v720_v11 = vsel %vm719_vm1, %v898_v54, %v716_v7 }
 0x136   :  { %733 = vst [vmem:[#allocation2 + $0x6] sm:$0x1] %v710_v53  ;;  %v725_v12 = vsel %vm722_vm2, %v724_v9, %v720_v11 }
 0x137   :  { %734 = vst [vmem:[#allocation2 + $0x7] sm:$0x1] %v725_v12 }
 0x138   :  { %745 = dma.vmem_to_hbm [thread:$0]  %s741_s16, 128, %s743_s19, [#allocation3]  }
 0x139   :  { %923 = dma.done.wait [#allocation3], 128  }
 0x13a   :  { %924 = vsyncadd [#allocation3], 4294967168 }
 0x13b   :  { %750 = vsyncpa [#allocation3], 1 }

// kernel: tpu_custom_call.1
= control target key start
LH: loop header
LB: loop body
LE: loop exit
PB: predicated region body
PF: predicated region fallthrough
CT: control target
= control target key end

     0   :  { %v15_v1 = vlaneseq  ;;  %s1213_s0 = inlined_call_operand.vmem [shape: s32[1,1,2048], index: 0, kind: input, shape index: {}]   ;;  %s1214_s1 = inlined_call_operand.vmem [shape: bf16[32,16], index: 1, kind: input, shape index: {}]   ;;  %s1215_s2 = inlined_call_operand.hbm [shape: f32[1,8,128], index: 2, kind: output, shape index: {}]  }
   0x1   :  { %v13_v0 = vld [vmem:[%s1213_s0] sm:$0xff] }
   0x2   :  { %v18_v2 = vperm.slane %v13_v0, 0  ;;  %v19_v3 = vperm.slane %v13_v0, 1 }
   0x3   :  { %7 = vsyncpa [#allocation3], 0  ;;  %v945_v4 = vshrl.u32 %v15_v1, 7  ;;  %v20_v5 = vperm.slane %v13_v0, 2  ;;  %v21_v6 = vperm.slane %v13_v0, 3  ;;  %v24_v9 = vperm.slane %v13_v0, 6 }
   0x4   :  { %v25_v11 = vperm.slane %v13_v0, 7  ;;  %v22_v12 = vperm.slane %v13_v0, 4  ;;  %v987_v17 = vld [vmem:[%s1214_s1] sm:$0xff]  ;;  %v23_v18 = vperm.slane %v13_v0, 5  ;;  %v925_v19 = vmov 1.0|1.0  }
   0x5   :  { %v948_v7 = vadd.s32 8, %v945_v4  ;;  %vm951_vm0 = vcmp.eq.s32.totalorder %v945_v4, %v18_v2  ;;  %vm956_vm1 = vcmp.eq.s32.totalorder %v945_v4, %v19_v3  ;;  %vm963_vm4 = vcmp.eq.s32.totalorder %v945_v4, %v20_v5  ;;  %v14_v23 = vld [vmem:[%s1213_s0 + $0x8] sm:$0xff]  ;;  %s742_s19 = sshll.u32 %s1215_s2, 4  ;;  %s743_s19 = int_to_ptr.hbm [resolvable:$true] %s742_s19 }
   0x6   :  { %vm975_vm7 = vcmp.eq.s32.totalorder %v945_v4, %v21_v6  ;;  %vm160_vm10 = vcmask 130048   ;;  %vm993_vm11 = vcmp.eq.s32.totalorder %v945_v4, %v24_v9  ;;  %vm1008_vm14 = vcmp.eq.s32.totalorder %v945_v4, %v25_v11  ;;  %v864_v28 = vld [vmem:[%s1214_s1 + $0x8] sm:$0xff]  ;;  %s926_s1 = smov [#allocation2]  }
   0x7   :  { %vm50_vm2 = vcmp.eq.s32.totalorder %v948_v7, %v18_v2  ;;  %vm51_vm3 = vcmp.eq.s32.totalorder %v948_v7, %v19_v3  ;;  %vm968_vm5 = vcmp.eq.s32.totalorder %v948_v7, %v20_v5  ;;  %vm980_vm8 = vcmp.eq.s32.totalorder %v948_v7, %v21_v6  ;;  %s740_s16 = sshll.u32 %s926_s1, 4  ;;  %s741_s16 = int_to_ptr.vmem [resolvable:$true] %s740_s16 }
   0x8   :  { %vm791_vm6 = vmpackc.low %vm50_vm2, %vm951_vm0  ;;  %vm998_vm12 = vcmp.eq.s32.totalorder %v948_v7, %v24_v9  ;;  %vm57_vm15 = vcmp.eq.s32.totalorder %v948_v7, %v25_v11  ;;  %vm54_vm2 = vcmp.eq.s32.totalorder %v948_v7, %v22_v12  ;;  %v28_v24 = vperm.slane %v14_v23, 2 }
   0x9   :  { %792 = vmatpush.bf16.msk.msra.mxu0 %vm791_vm6, %v925_v19  ;;  %vm795_vm9 = vmpackc.low %vm51_vm3, %vm956_vm1  ;;  %vm38_vm1 = vcmp.eq.s32.totalorder %v945_v4, %v22_v12  ;;  %v29_v25 = vperm.slane %v14_v23, 3  ;;  %v26_v26 = vperm.slane %v14_v23, 0  ;;  %v27_v27 = vperm.slane %v14_v23, 1 }
   0xa   :  { %796 = vmatpush.bf16.msk.msra.mxu1 %vm795_vm9, %v925_v19  ;;  %vm799_vm13 = vmpackc.low %vm968_vm5, %vm963_vm4  ;;  %vm39_vm4 = vcmp.eq.s32.totalorder %v945_v4, %v23_v18  ;;  %vm55_vm5 = vcmp.eq.s32.totalorder %v948_v7, %v23_v18  ;;  %vm44_vm9 = vcmp.eq.s32.totalorder %v945_v4, %v28_v24  ;;  %v32_v29 = vperm.slane %v14_v23, 6 }
   0xb   :  { %800 = vmatpush.bf16.msk.msra.mxu2 %vm799_vm13, %v925_v19  ;;  %vm803_vm0 = vmpackc.low %vm980_vm8, %vm975_vm7  ;;  %vm61_vm13 = vcmp.eq.s32.totalorder %v948_v7, %v29_v25  ;;  %v33_v30 = vperm.slane %v14_v23, 7  ;;  %v30_v31 = vperm.slane %v14_v23, 4  ;;  %v31_v32 = vperm.slane %v14_v23, 5 }
   0xc   :  { %804 = vmatpush.bf16.msk.msra.mxu3 %vm803_vm0, %v925_v19  ;;  %793 = vmatmul.msk.bf16.vlgmr.msra.gmra.mxu0 %vm160_vm10, %v987_v17  ;;  %vm815_vm3 = vmpackc.low %vm998_vm12, %vm993_vm11  ;;  %vm60_vm11 = vcmp.eq.s32.totalorder %v948_v7, %v28_v24  ;;  %vm45_vm12 = vcmp.eq.s32.totalorder %v945_v4, %v29_v25  ;;  %vm58_vm0 = vcmp.eq.s32.totalorder %v948_v7, %v26_v26 }
   0xd   :  { %797 = vmatmul.msk.bf16.vlgmr.msra.gmra.mxu1 %vm160_vm10, %v987_v17  ;;  %vm819_vm6 = vmpackc.low %vm57_vm15, %vm1008_vm14  ;;  %vm42_vm15 = vcmp.eq.s32.totalorder %v945_v4, %v26_v26 }
   0xe   :  { %801 = vmatmul.msk.bf16.vlgmr.msra.gmra.mxu2 %vm160_vm10, %v987_v17  ;;  %vm807_vm7 = vmpackc.low %vm54_vm2, %vm38_vm1  ;;  %vm43_vm1 = vcmp.eq.s32.totalorder %v945_v4, %v27_v27  ;;  %vm59_vm2 = vcmp.eq.s32.totalorder %v948_v7, %v27_v27 }
   0xf   :  { %816 = vmatpush.bf16.msk.msrb.mxu2 %vm815_vm3, %v925_v19  ;;  %805 = vmatmul.msk.bf16.vlgmr.msra.gmra.mxu3 %vm160_vm10, %v987_v17  ;;  %vm811_vm8 = vmpackc.low %vm55_vm5, %vm39_vm4 }
  0x10   :  { %820 = vmatpush.bf16.msk.msrb.mxu3 %vm819_vm6, %v925_v19  ;;  %808 = vmatpush.bf16.msk.msrb.mxu0 %vm807_vm7, %v925_v19  ;;  %vm831_vm14 = vmpackc.low %vm60_vm11, %vm44_vm9  ;;  %vm48_vm6 = vcmp.eq.s32.totalorder %v945_v4, %v32_v29  ;;  %vm64_vm7 = vcmp.eq.s32.totalorder %v948_v7, %v32_v29  ;;  %vm65_vm9 = vcmp.eq.s32.totalorder %v948_v7, %v33_v30 }
  0x11   :  { %812 = vmatpush.bf16.msk.msrb.mxu1 %vm811_vm8, %v925_v19  ;;  %vm835_vm3 = vmpackc.low %vm61_vm13, %vm45_vm12  ;;  %vm49_vm8 = vcmp.eq.s32.totalorder %v945_v4, %v33_v30  ;;  %vm46_vm12 = vcmp.eq.s32.totalorder %v945_v4, %v30_v31  ;;  %vm62_vm13 = vcmp.eq.s32.totalorder %v948_v7, %v30_v31 }
  0x12   :  { %vm823_vm4 = vmpackc.low %vm58_vm0, %vm42_vm15  ;;  %vm63_vm15 = vcmp.eq.s32.totalorder %v948_v7, %v31_v32 }
  0x13   :  { %832 = vmatpush.bf16.msk.msra.mxu2 %vm831_vm14, %v925_v19  ;;  %vm827_vm5 = vmpackc.low %vm59_vm2, %vm43_vm1  ;;  %vm47_vm14 = vcmp.eq.s32.totalorder %v945_v4, %v31_v32 }
  0x14   :  { %836 = vmatpush.bf16.msk.msra.mxu3 %vm835_vm3, %v925_v19  ;;  %824 = vmatpush.bf16.msk.msra.mxu0 %vm823_vm4, %v925_v19  ;;  %vm847_vm11 = vmpackc.low %vm64_vm7, %vm48_vm6 }
  0x15   :  { %828 = vmatpush.bf16.msk.msra.mxu1 %vm827_vm5, %v925_v19  ;;  %vm851_vm0 = vmpackc.low %vm65_vm9, %vm49_vm8 }
  0x16   :  { %vm839_vm1 = vmpackc.low %vm62_vm13, %vm46_vm12 }
  0x17   :  { %vm843_vm2 = vmpackc.low %vm63_vm15, %vm47_vm14 }
  0x1c   :  { %794 = vmatmul.msk.bf16.gmra.mxu0 %vm160_vm10, %v864_v28 }
  0x1d   :  { %798 = vmatmul.msk.bf16.gmra.mxu1 %vm160_vm10, %v864_v28 }
  0x1e   :  { %802 = vmatmul.msk.bf16.gmra.mxu2 %vm160_vm10, %v864_v28 }
  0x1f   :  { %806 = vmatmul.msk.bf16.gmra.mxu3 %vm160_vm10, %v864_v28 }
  0x2c   :  { %809 = vmatmul.msk.bf16.vlgmr.msrb.gmra.mxu0 %vm160_vm10, %v987_v17 }
  0x2d   :  { %813 = vmatmul.msk.bf16.vlgmr.msrb.gmra.mxu1 %vm160_vm10, %v987_v17  ;;  %840 = vmatpush.bf16.msk.msrb.mxu0 %vm839_vm1, %v925_v19 }
  0x2e   :  { %817 = vmatmul.msk.bf16.vlgmr.msrb.gmra.mxu2 %vm160_vm10, %v987_v17  ;;  %844 = vmatpush.bf16.msk.msrb.mxu1 %vm843_vm2, %v925_v19 }
  0x2f   :  { %821 = vmatmul.msk.bf16.vlgmr.msrb.gmra.mxu3 %vm160_vm10, %v987_v17  ;;  %848 = vmatpush.bf16.msk.msrb.mxu2 %vm847_vm11, %v925_v19 }
  0x30   :  { %852 = vmatpush.bf16.msk.msrb.mxu3 %vm851_vm0, %v925_v19 }
  0x3c   :  { %810 = vmatmul.msk.bf16.gmra.mxu0 %vm160_vm10, %v864_v28 }
  0x3d   :  { %814 = vmatmul.msk.bf16.gmra.mxu1 %vm160_vm10, %v864_v28 }
  0x3e   :  { %818 = vmatmul.msk.bf16.gmra.mxu2 %vm160_vm10, %v864_v28 }
  0x3f   :  { %822 = vmatmul.msk.bf16.gmra.mxu3 %vm160_vm10, %v864_v28 }
  0x4c   :  { %825 = vmatmul.msk.bf16.vlgmr.msra.gmra.mxu0 %vm160_vm10, %v987_v17 }
  0x4d   :  { %829 = vmatmul.msk.bf16.vlgmr.msra.gmra.mxu1 %vm160_vm10, %v987_v17 }
  0x4e   :  { %833 = vmatmul.msk.bf16.vlgmr.msra.gmra.mxu2 %vm160_vm10, %v987_v17 }
  0x4f   :  { %837 = vmatmul.msk.bf16.vlgmr.msra.gmra.mxu3 %vm160_vm10, %v987_v17 }
  0x5c   :  { %826 = vmatmul.msk.bf16.gmra.mxu0 %vm160_vm10, %v864_v28 }
  0x5d   :  { %830 = vmatmul.msk.bf16.gmra.mxu1 %vm160_vm10, %v864_v28 }
  0x5e   :  { %834 = vmatmul.msk.bf16.gmra.mxu2 %vm160_vm10, %v864_v28 }
  0x5f   :  { %838 = vmatmul.msk.bf16.gmra.mxu3 %vm160_vm10, %v864_v28 }
  0x6c   :  { %841 = vmatmul.msk.bf16.vlgmr.msrb.gmra.mxu0 %vm160_vm10, %v987_v17 }
  0x6d   :  { %845 = vmatmul.msk.bf16.vlgmr.msrb.gmra.mxu1 %vm160_vm10, %v987_v17 }
  0x6e   :  { %849 = vmatmul.msk.bf16.vlgmr.msrb.gmra.mxu2 %vm160_vm10, %v987_v17 }
  0x6f   :  { %853 = vmatmul.msk.bf16.vlgmr.msrb.gmra.mxu3 %vm160_vm10, %v987_v17 }
  0x7c   :  { %842 = vmatmul.msk.bf16.gmra.mxu0 %vm160_vm10, %v864_v28 }
  0x7d   :  { %846 = vmatmul.msk.bf16.gmra.mxu1 %vm160_vm10, %v864_v28 }
  0x7e   :  { %850 = vmatmul.msk.bf16.gmra.mxu2 %vm160_vm10, %v864_v28 }
  0x7f   :  { %854 = vmatmul.msk.bf16.gmra.mxu3 %vm160_vm10, %v864_v28 }
  0x89   :  { %v176_v33 = vpop.f32.mrf.mxu0 }
  0x8a   :  { %v195_v34 = vpop.f32.mrf.mxu1 }
  0x91   :  { %v214_v35 = vpop.f32.mrf.mxu2  ;;  %v178_v36 = vpop.f32.mrf.mxu0 }
  0x92   :  { %v233_v37 = vpop.f32.mrf.mxu3  ;;  %v197_v38 = vpop.f32.mrf.mxu1 }
  0x99   :  { %v216_v39 = vpop.f32.mrf.mxu2  ;;  %v181_v40 = vpop.f32.mrf.mxu0 }
  0x9a   :  { %v235_v41 = vpop.f32.mrf.mxu3  ;;  %v200_v42 = vpop.f32.mrf.mxu1 }
  0xa1   :  { %v219_v43 = vpop.f32.mrf.mxu2  ;;  %v183_v44 = vpop.f32.mrf.mxu0 }
  0xa2   :  { %v238_v45 = vpop.f32.mrf.mxu3  ;;  %v202_v46 = vpop.f32.mrf.mxu1 }
  0xa9   :  { %v1111_v47 = vpop.f32.mrf.mxu2  ;;  %v1113_v48 = vpop.f32.mrf.mxu0 }
  0xaa   :  { %v1115_v49 = vpop.f32.mrf.mxu3  ;;  %v1117_v50 = vpop.f32.mrf.mxu1 }
  0xb1   :  { %v1119_v51 = vpop.f32.mrf.mxu2  ;;  %v1121_v52 = vpop.f32.mrf.mxu0 }
  0xb2   :  { %v1123_v53 = vpop.f32.mrf.mxu3  ;;  %v1125_v54 = vpop.f32.mrf.mxu1 }
  0xb9   :  { %v1127_v55 = vpop.f32.mrf.mxu2  ;;  %v1129_v56 = vpop.f32.mrf.mxu0 }
  0xba   :  { %v1131_v57 = vpop.f32.mrf.mxu3  ;;  %v1133_v58 = vpop.f32.mrf.mxu1 }
  0xc1   :  { %v1135_v59 = vpop.f32.mrf.mxu2  ;;  %v1137_v60 = vpop.f32.mrf.mxu0 }
  0xc2   :  { %v1139_v61 = vpop.f32.mrf.mxu3  ;;  %v1141_v62 = vpop.f32.mrf.mxu1 }
  0xc9   :  { %v1143_v63 = vpop.f32.mrf.mxu2  ;;  %v328_v0 = vpop.f32.mrf.mxu0 }
  0xca   :  { %v1145_v1 = vpop.f32.mrf.mxu3  ;;  %v347_v2 = vpop.f32.mrf.mxu1  ;;  %v471_v5 = vmul.f32 %v328_v0, %v176_v33 }
  0xcb   :  { %v472_v9 = vmul.f32 %v347_v2, %v195_v34 }
  0xd1   :  { %v366_v3 = vpop.f32.mrf.mxu2  ;;  %v330_v4 = vpop.f32.mrf.mxu0 }
  0xd2   :  { %v385_v6 = vpop.f32.mrf.mxu3  ;;  %v479_v7 = vmul.f32 %v330_v4, %v178_v36  ;;  %v349_v8 = vpop.f32.mrf.mxu1  ;;  %v473_v15 = vmul.f32 %v366_v3, %v214_v35 }
  0xd3   :  { %v480_v10 = vmul.f32 %v349_v8, %v197_v38  ;;  %v474_v20 = vmul.f32 %v385_v6, %v233_v37 }
  0xd4   :  { %v503_v11 = vadd.f32 %v479_v7, %v471_v5 }
  0xd5   :  { %v512_v12 = vadd.f32 %v480_v10, %v472_v9 }
  0xd9   :  { %v368_v13 = vpop.f32.mrf.mxu2  ;;  %v333_v14 = vpop.f32.mrf.mxu0 }
  0xda   :  { %v481_v16 = vmul.f32 %v368_v13, %v216_v39  ;;  %v387_v17 = vpop.f32.mrf.mxu3  ;;  %v487_v18 = vmul.f32 %v333_v14, %v181_v40  ;;  %v352_v19 = vpop.f32.mrf.mxu1 }
  0xdb   :  { %v482_v21 = vmul.f32 %v387_v17, %v235_v41  ;;  %v488_v22 = vmul.f32 %v352_v19, %v200_v42 }
  0xdc   :  { %v521_v23 = vadd.f32 %v481_v16, %v473_v15  ;;  %v504_v24 = vadd.f32 %v503_v11, %v487_v18 }
  0xdd   :  { %v530_v25 = vadd.f32 %v482_v21, %v474_v20  ;;  %v513_v26 = vadd.f32 %v512_v12, %v488_v22 }
  0xe1   :  { %v371_v27 = vpop.f32.mrf.mxu2  ;;  %v335_v28 = vpop.f32.mrf.mxu0 }
  0xe2   :  { %v489_v29 = vmul.f32 %v371_v27, %v219_v43  ;;  %v390_v30 = vpop.f32.mrf.mxu3  ;;  %v495_v31 = vmul.f32 %v335_v28, %v183_v44  ;;  %v354_v32 = vpop.f32.mrf.mxu1 }
  0xe3   :  { %v490_v33 = vmul.f32 %v390_v30, %v238_v45  ;;  %v496_v34 = vmul.f32 %v354_v32, %v202_v46 }
  0xe4   :  { %v522_v35 = vadd.f32 %v521_v23, %v489_v29  ;;  %v505_v36 = vadd.f32 %v504_v24, %v495_v31 }
  0xe5   :  { %v531_v38 = vadd.f32 %v530_v25, %v490_v33  ;;  %v514_v39 = vadd.f32 %v513_v26, %v496_v34 }
  0xe6   :  { %v506_v40 = vrot.slane %v505_v36, 4 }
  0xe7   :  { %v515_v37 = vrot.slane %v514_v39, 4 }
  0xe8   :  { %v507_v41 = vadd.f32 %v506_v40, %v505_v36 }
  0xe9   :  { %v516_v42 = vadd.f32 %v515_v37, %v514_v39  ;;  %v373_v0 = vpop.f32.mrf.mxu2  ;;  %v404_v2 = vpop.f32.mrf.mxu0 }
  0xea   :  { %v508_v3 = vrot.slane %v507_v41, 2  ;;  %v497_v4 = vmul.f32 %v373_v0, %v1111_v47  ;;  %v392_v5 = vpop.f32.mrf.mxu3  ;;  %v423_v43 = vpop.f32.mrf.mxu1  ;;  %v475_v20 = vmul.f32 %v404_v2, %v1113_v48 }
  0xeb   :  { %v517_v6 = vrot.slane %v516_v42, 2  ;;  %v498_v44 = vmul.f32 %v392_v5, %v1115_v49  ;;  %v476_v25 = vmul.f32 %v423_v43, %v1117_v50 }
  0xec   :  { %v509_v45 = vadd.f32 %v508_v3, %v507_v41  ;;  %v523_v46 = vadd.f32 %v522_v35, %v497_v4 }
  0xed   :  { %v518_v7 = vadd.f32 %v517_v6, %v516_v42  ;;  %v532_v8 = vadd.f32 %v531_v38, %v498_v44 }
  0xee   :  { %v510_v9 = vrot.slane %v509_v45, 1  ;;  %v524_v10 = vrot.slane %v523_v46, 4 }
  0xef   :  { %v519_v11 = vrot.slane %v518_v7, 1  ;;  %v533_v12 = vrot.slane %v532_v8, 4 }
  0xf0   :  { %v511_v13 = vadd.f32 %v510_v9, %v509_v45  ;;  %v525_v14 = vadd.f32 %v524_v10, %v523_v46 }
  0xf1   :  { %v520_v15 = vadd.f32 %v519_v11, %v518_v7  ;;  %v534_v16 = vadd.f32 %v533_v12, %v532_v8  ;;  %v442_v17 = vpop.f32.mrf.mxu2  ;;  %v406_v18 = vpop.f32.mrf.mxu0 }
  0xf2   :  { %v855_v47 = vmul.f32 -1.442695, %v511_v13  ;;  %v526_v19 = vrot.slane %v525_v14, 2  ;;  %v461_v21 = vpop.f32.mrf.mxu3  ;;  %v483_v49 = vmul.f32 %v406_v18, %v1121_v52  ;;  %v425_v22 = vpop.f32.mrf.mxu1  ;;  %v477_v38 = vmul.f32 %v442_v17, %v1119_v51 }
  0xf3   :  { %v856_v23 = vmul.f32 -1.442695, %v520_v15  ;;  %v535_v24 = vrot.slane %v534_v16, 2  ;;  %v484_v26 = vmul.f32 %v425_v22, %v1125_v54  ;;  %v478_v51 = vmul.f32 %v461_v21, %v1123_v53 }
  0xf4   :  { %867 = vpow2.f32 %v855_v47  ;;  %v527_v27 = vadd.f32 %v526_v19, %v525_v14  ;;  %v539_v28 = vadd.f32 %v483_v49, %v475_v20 }
  0xf5   :  { %869 = vpow2.f32 %v856_v23  ;;  %v536_v29 = vadd.f32 %v535_v24, %v534_v16  ;;  %v548_v30 = vadd.f32 %v484_v26, %v476_v25 }
  0xf6   :  { %v528_v31 = vrot.slane %v527_v27, 1 }
  0xf7   :  { %v537_v32 = vrot.slane %v536_v29, 1 }
  0xf8   :  { %v529_v33 = vadd.f32 %v528_v31, %v527_v27 }
  0xf9   :  { %v538_v48 = vadd.f32 %v537_v32, %v536_v29  ;;  %v444_v34 = vpop.f32.mrf.mxu2  ;;  %v409_v35 = vpop.f32.mrf.mxu0 }
  0xfa   :  { %v868_v52 = vpop.eup %867  ;;  %v857_v36 = vmul.f32 -1.442695, %v529_v33  ;;  %v485_v50 = vmul.f32 %v444_v34, %v1127_v55  ;;  %v463_v39 = vpop.f32.mrf.mxu3  ;;  %v491_v54 = vmul.f32 %v409_v35, %v1129_v56 }
  0xfb   :  { %v428_v40 = vpop.f32.mrf.mxu1  ;;  %v870_v37 = vpop.eup %869  ;;  %v599_v41 = vadd.f32 1.0, %v868_v52  ;;  %v858_v42 = vmul.f32 -1.442695, %v538_v48  ;;  %v486_v0 = vmul.f32 %v463_v39, %v1131_v57 }
  0xfc   :  { %v492_v2 = vmul.f32 %v428_v40, %v1133_v58  ;;  %v1158_v3 = vadd.f32 1.0, %v870_v37  ;;  %871 = vpow2.f32 %v857_v36  ;;  %v557_v4 = vadd.f32 %v485_v50, %v477_v38 }
  0xfd   :  { %v540_v5 = vadd.f32 %v539_v28, %v491_v54  ;;  %873 = vrcp.f32 %v599_v41  ;;  %v566_v55 = vadd.f32 %v486_v0, %v478_v51  ;;  %v616_v45 = vand.u32 2147483647, %v599_v41 }
  0xfe   :  { %875 = vrcp.f32 %v1158_v3  ;;  %v549_v56 = vadd.f32 %v548_v30, %v492_v2  ;;  %v618_v57 = vand.u32 2147483648, %v599_v41  ;;  %vm612_vm10 = vweird.f32 %v599_v41 }
  0xff   :  { %877 = vpow2.f32 %v858_v42  ;;  %vm627_vm3 = vweird.f32 %v1158_v3  ;;  %v633_v17 = vand.u32 2147483648, %v1158_v3  ;;  %vm1173_vm4 = vcmp.eq.f32.partialorder %v616_v45, 8.507059e+37 }
 0x101   :  { %v447_v43 = vpop.f32.mrf.mxu2  ;;  %v411_v6 = vpop.f32.mrf.mxu0  ;;  %v634_v26 = vor.u32 1.1754944e-38, %v633_v17 }
 0x102   :  { %v872_v44 = vpop.eup %871  ;;  %v493_v58 = vmul.f32 %v447_v43, %v1135_v59  ;;  %v466_v46 = vpop.f32.mrf.mxu3  ;;  %v499_v7 = vmul.f32 %v411_v6, %v1137_v60  ;;  %v631_v60 = vand.u32 2147483647, %v1158_v3 }
 0x103   :  { %v430_v8 = vpop.f32.mrf.mxu1  ;;  %v874_v9 = vpop.eup %873  ;;  %v1164_v10 = vadd.f32 1.0, %v872_v44  ;;  %v494_v53 = vmul.f32 %v466_v46, %v1139_v61 }
 0x104   :  { %v500_v11 = vmul.f32 %v430_v8, %v1141_v62  ;;  %v876_v12 = vpop.eup %875  ;;  %v608_v13 = vmul.f32 %v874_v9, %v599_v41  ;;  %v558_v14 = vadd.f32 %v557_v4, %v493_v58  ;;  %v541_v15 = vadd.f32 %v540_v5, %v499_v7 }
 0x105   :  { %v878_v16 = vpop.eup %877  ;;  %v623_v59 = vmul.f32 %v876_v12, %v1158_v3  ;;  %879 = vrcp.f32 %v1164_v10  ;;  %v619_v62 = vor.u32 1.1754944e-38, %v618_v57  ;;  %v567_v20 = vadd.f32 %v566_v55, %v494_v53 }
 0x106   :  { %v609_v18 = vsub.f32 1.0, %v608_v13  ;;  %v1177_v47 = vadd.f32 1.0, %v878_v16  ;;  %v542_v21 = vrot.slane %v541_v15, 4  ;;  %v550_v49 = vadd.f32 %v549_v56, %v500_v11 }
 0x107   :  { %v624_v19 = vsub.f32 1.0, %v623_v59  ;;  %vm613_vm5 = vweird.f32 %v874_v9  ;;  %v646_v23 = vand.u32 2147483647, %v1164_v10  ;;  %vm628_vm6 = vweird.f32 %v876_v12 }
 0x108   :  { %v610_v22 = vmul.f32 %v874_v9, %v609_v18  ;;  %881 = vrcp.f32 %v1177_v47  ;;  %vm1181_vm7 = vcmp.eq.f32.partialorder %v631_v60, 8.507059e+37  ;;  %v543_v29 = vadd.f32 %v542_v21, %v541_v15  ;;  %vm614_vm8 = vmor %vm612_vm10, %vm613_vm5 }
 0x109   :  { %v625_v24 = vmul.f32 %v876_v12, %v624_v19  ;;  %v449_v27 = vpop.f32.mrf.mxu2  ;;  %v551_v30 = vrot.slane %v550_v49, 4  ;;  %vm642_vm9 = vweird.f32 %v1164_v10  ;;  %v648_v34 = vand.u32 2147483648, %v1164_v10  ;;  %vm629_vm11 = vmor %vm627_vm3, %vm628_vm6 }
 0x10a   :  { %v611_v28 = vadd.f32 %v874_v9, %v610_v22  ;;  %v501_v31 = vmul.f32 %v449_v27, %v1143_v63  ;;  %v468_v32 = vpop.f32.mrf.mxu3  ;;  %vm1194_vm12 = vcmp.eq.f32.partialorder %v646_v23, 8.507059e+37  ;;  %v544_v38 = vrot.slane %v543_v29, 2 }
 0x10b   :  { %v880_v33 = vpop.eup %879  ;;  %v626_v48 = vadd.f32 %v876_v12, %v625_v24  ;;  %v502_v35 = vmul.f32 %v468_v32, %v1145_v1  ;;  %v552_v54 = vadd.f32 %v551_v30, %v550_v49  ;;  %v649_v2 = vor.u32 1.1754944e-38, %v648_v34 }
 0x10c   :  { %v615_v52 = vsel %vm614_vm8, %v874_v9, %v611_v28  ;;  %v638_v36 = vmul.f32 %v880_v33, %v1164_v10  ;;  %v559_v40 = vadd.f32 %v558_v14, %v501_v31  ;;  %v545_v42 = vadd.f32 %v544_v38, %v543_v29 }
 0x10d   :  { %v620_v50 = vsel %vm1173_vm4, %v619_v62, %v615_v52  ;;  %v630_v39 = vsel %vm629_vm11, %v876_v12, %v626_v48  ;;  %v568_v0 = vadd.f32 %v567_v20, %v502_v35  ;;  %v553_v4 = vrot.slane %v552_v54, 2 }
 0x10e   :  { %v882_v37 = vpop.eup %881  ;;  %727 = vst [vmem:[#allocation2] sm:$0x1] %v620_v50  ;;  %v635_v1 = vsel %vm1181_vm7, %v634_v26, %v630_v39  ;;  %v639_v41 = vsub.f32 1.0, %v638_v36  ;;  %v560_v5 = vrot.slane %v559_v40, 4  ;;  %vm643_vm13 = vweird.f32 %v880_v33 }
 0x10f   :  { %728 = vst [vmem:[#allocation2 + $0x1] sm:$0x1] %v635_v1  ;;  %v653_v3 = vmul.f32 %v882_v37, %v1177_v47  ;;  %v546_v55 = vrot.slane %v545_v42, 1  ;;  %v569_v56 = vrot.slane %v568_v0, 4  ;;  %v661_v6 = vand.u32 2147483647, %v1177_v47  ;;  %vm644_vm14 = vmor %vm642_vm9, %vm643_vm13 }
 0x110   :  { %v640_v51 = vmul.f32 %v880_v33, %v639_v41  ;;  %v554_v44 = vadd.f32 %v553_v4, %v552_v54  ;;  %v561_v45 = vadd.f32 %v560_v5, %v559_v40  ;;  %v663_v58 = vand.u32 2147483648, %v1177_v47 }
 0x111   :  { %v654_v43 = vsub.f32 1.0, %v653_v3  ;;  %v547_v46 = vadd.f32 %v546_v55, %v545_v42  ;;  %v570_v7 = vadd.f32 %v569_v56, %v568_v0  ;;  %vm658_vm15 = vweird.f32 %v882_v37 }
 0x112   :  { %v641_v57 = vadd.f32 %v880_v33, %v640_v51  ;;  %v555_v9 = vrot.slane %v554_v44, 1  ;;  %v562_v53 = vrot.slane %v561_v45, 2  ;;  %vm657_vm0 = vweird.f32 %v1177_v47 }
 0x113   :  { %v655_v8 = vmul.f32 %v882_v37, %v654_v43  ;;  %v859_v12 = vmul.f32 -1.442695, %v547_v46  ;;  %v571_v13 = vrot.slane %v570_v7, 2  ;;  %vm659_vm1 = vmor %vm657_vm0, %vm658_vm15  ;;  %v664_v60 = vor.u32 1.1754944e-38, %v663_v58 }
 0x114   :  { %v645_v11 = vsel %vm644_vm14, %v880_v33, %v641_v57  ;;  %v556_v16 = vadd.f32 %v555_v9, %v554_v44  ;;  %v563_v59 = vadd.f32 %v562_v53, %v561_v45  ;;  %vm662_vm2 = vcmp.eq.f32.partialorder %v661_v6, 8.507059e+37 }
 0x115   :  { %v650_v14 = vsel %vm1194_vm12, %v649_v2, %v645_v11  ;;  %v656_v15 = vadd.f32 %v882_v37, %v655_v8  ;;  %883 = vpow2.f32 %v859_v12  ;;  %v572_v10 = vadd.f32 %v571_v13, %v570_v7 }
 0x116   :  { %729 = vst [vmem:[#allocation2 + $0x2] sm:$0x1] %v650_v14  ;;  %v860_v18 = vmul.f32 -1.442695, %v556_v16  ;;  %v564_v61 = vrot.slane %v563_v59, 1 }
 0x117   :  { %v660_v17 = vsel %vm659_vm1, %v882_v37, %v656_v15  ;;  %v573_v19 = vrot.slane %v572_v10, 1 }
 0x118   :  { %v665_v62 = vsel %vm662_vm2, %v664_v60, %v660_v17  ;;  %885 = vpow2.f32 %v860_v18  ;;  %v565_v47 = vadd.f32 %v564_v61, %v563_v59 }
 0x119   :  { %730 = vst [vmem:[#allocation2 + $0x3] sm:$0x1] %v665_v62  ;;  %v574_v20 = vadd.f32 %v573_v19, %v572_v10 }
 0x11a   :  { %v861_v21 = vmul.f32 -1.442695, %v565_v47 }
 0x11b   :  { %v884_v49 = vpop.eup %883  ;;  %v862_v22 = vmul.f32 -1.442695, %v574_v20 }
 0x11c   :  { %v603_v23 = vadd.f32 1.0, %v884_v49  ;;  %887 = vpow2.f32 %v861_v21 }
 0x11d   :  { %889 = vpow2.f32 %v862_v22 }
 0x11e   :  { %v886_v24 = vpop.eup %885  ;;  %891 = vrcp.f32 %v603_v23  ;;  %v676_v48 = vand.u32 2147483647, %v603_v23  ;;  %v678_v34 = vand.u32 2147483648, %v603_v23  ;;  %vm672_vm3 = vweird.f32 %v603_v23 }
 0x11f   :  { %v604_v25 = vadd.f32 1.0, %v886_v24 }
 0x120   :  { %vm677_vm4 = vcmp.eq.f32.partialorder %v676_v48, 8.507059e+37  ;;  %v679_v40 = vor.u32 1.1754944e-38, %v678_v34 }
 0x121   :  { %893 = vrcp.f32 %v604_v25  ;;  %v691_v36 = vand.u32 2147483647, %v604_v25  ;;  %v693_v38 = vand.u32 2147483648, %v604_v25  ;;  %vm687_vm7 = vweird.f32 %v604_v25 }
 0x122   :  { %v888_v26 = vpop.eup %887 }
 0x123   :  { %v890_v27 = vpop.eup %889  ;;  %v605_v28 = vadd.f32 1.0, %v888_v26  ;;  %vm692_vm8 = vcmp.eq.f32.partialorder %v691_v36, 8.507059e+37  ;;  %v694_v3 = vor.u32 1.1754944e-38, %v693_v38 }
 0x124   :  { %v892_v29 = vpop.eup %891  ;;  %v606_v30 = vadd.f32 1.0, %v890_v27 }
 0x125   :  { %v668_v31 = vmul.f32 %v892_v29, %v603_v23  ;;  %895 = vrcp.f32 %v605_v28  ;;  %vm673_vm10 = vweird.f32 %v892_v29  ;;  %v706_v5 = vand.u32 2147483647, %v605_v28 }
 0x126   :  { %897 = vrcp.f32 %v606_v30  ;;  %vm674_vm5 = vmor %vm672_vm3, %vm673_vm10  ;;  %v708_v51 = vand.u32 2147483648, %v605_v28  ;;  %v723_v6 = vand.u32 2147483648, %v606_v30  ;;  %v721_v57 = vand.u32 2147483647, %v606_v30 }
 0x127   :  { %v894_v32 = vpop.eup %893  ;;  %v669_v33 = vsub.f32 1.0, %v668_v31  ;;  %vm702_vm13 = vweird.f32 %v605_v28  ;;  %vm717_vm15 = vweird.f32 %v606_v30  ;;  %vm707_vm0 = vcmp.eq.f32.partialorder %v706_v5, 8.507059e+37 }
 0x128   :  { %v683_v35 = vmul.f32 %v894_v32, %v604_v25  ;;  %vm688_vm6 = vweird.f32 %v894_v32  ;;  %v709_v46 = vor.u32 1.1754944e-38, %v708_v51  ;;  %v724_v9 = vor.u32 1.1754944e-38, %v723_v6 }
 0x129   :  { %v670_v52 = vmul.f32 %v892_v29, %v669_v33  ;;  %vm689_vm9 = vmor %vm687_vm7, %vm688_vm6  ;;  %vm722_vm2 = vcmp.eq.f32.partialorder %v721_v57, 8.507059e+37 }
 0x12a   :  { %v684_v63 = vsub.f32 1.0, %v683_v35 }
 0x12b   :  { %v896_v50 = vpop.eup %895  ;;  %v671_v39 = vadd.f32 %v892_v29, %v670_v52 }
 0x12c   :  { %v898_v54 = vpop.eup %897  ;;  %v685_v37 = vmul.f32 %v894_v32, %v684_v63  ;;  %v698_v1 = vmul.f32 %v896_v50, %v605_v28  ;;  %vm703_vm11 = vweird.f32 %v896_v50 }
 0x12d   :  { %v675_v41 = vsel %vm674_vm5, %v892_v29, %v671_v39  ;;  %v713_v42 = vmul.f32 %v898_v54, %v606_v30  ;;  %vm718_vm12 = vweird.f32 %v898_v54  ;;  %vm704_vm14 = vmor %vm702_vm13, %vm703_vm11 }
 0x12e   :  { %v680_v0 = vsel %vm677_vm4, %v679_v40, %v675_v41  ;;  %v686_v2 = vadd.f32 %v894_v32, %v685_v37  ;;  %v699_v4 = vsub.f32 1.0, %v698_v1  ;;  %vm719_vm1 = vmor %vm717_vm15, %vm718_vm12 }
 0x12f   :  { %731 = vst [vmem:[#allocation2 + $0x4] sm:$0x1] %v680_v0  ;;  %v714_v55 = vsub.f32 1.0, %v713_v42 }
 0x130   :  { %v690_v56 = vsel %vm689_vm9, %v894_v32, %v686_v2  ;;  %v700_v43 = vmul.f32 %v896_v50, %v699_v4 }
 0x131   :  { %v695_v44 = vsel %vm692_vm8, %v694_v3, %v690_v56  ;;  %v715_v45 = vmul.f32 %v898_v54, %v714_v55 }
 0x132   :  { %732 = vst [vmem:[#allocation2 + $0x5] sm:$0x1] %v695_v44  ;;  %v701_v58 = vadd.f32 %v896_v50, %v700_v43 }
 0x133   :  { %v716_v7 = vadd.f32 %v898_v54, %v715_v45 }
 0x134   :  { %v705_v8 = vsel %vm704_vm14, %v896_v50, %v701_v58 }
 0x135   :  { %v710_v53 = vsel %vm707_vm0, %v709_v46, %v705_v8  ;;  %v720_v11 = vsel %vm719_vm1, %v898_v54, %v716_v7 }
 0x136   :  { %733 = vst [vmem:[#allocation2 + $0x6] sm:$0x1] %v710_v53  ;;  %v725_v12 = vsel %vm722_vm2, %v724_v9, %v720_v11 }
 0x137   :  { %734 = vst [vmem:[#allocation2 + $0x7] sm:$0x1] %v725_v12 }
 0x138   :  { %745 = dma.vmem_to_hbm [thread:$0]  %s741_s16, 128, %s743_s19, [#allocation3]  }
 0x139   :  { %923 = dma.done.wait [#allocation3], 128  }
 0x13a   :  { %924 = vsyncadd [#allocation3], 4294967168 }
 0x13b   :  { %750 = vsyncpa [#allocation3], 1 }

</bundles_post_ra>
